<compile_context>
chip_gen: v7x
topology: tpu7x:2x2x1
jax: 0.10.0
libtpu: 0.0.40
codegen_flags: <defaults>
</compile_context>

<pallas_src>
import jax
import jax.numpy as jnp
from jax.experimental import pallas as pl
from jax.experimental.pallas import tpu as pltpu

EPS = 1e-5
# layer sizes from the PyTorch module (LazyLinear / LazyBatchNorm1d resolve to these)
DIMS = [66, 128, 256, 512, 1024, 128, 3]
IN_PAD = 128      # pad 66 -> 128 input features (zero pad) for lane-dense x loads
OUT_PAD = 128     # pad 3 -> 128 classifier width for lane-dense output stores
NEG_BIG = -1e30   # bias of padded classifier columns -> exp() underflows to exactly 0


def _mlp_kernel(x_ref,
                w1_ref, t1_ref,
                w2_ref, t2_ref,
                w3_ref, t3_ref,
                w4_ref, t4_ref,
                w5_ref, t5_ref,
                w6_ref, b6_ref,
                out_ref):
    h = x_ref[...]                                   # (TM, IN_PAD) bf16

    def layer(h_bf16, w_ref, t_ref):
        # bf16 operands -> MXU fast path; f32 accumulation; BN scale already folded into W.
        z = jnp.dot(h_bf16, w_ref[...], preferred_element_type=jnp.float32)
        z = z + t_ref[...]                           # folded BN(eval) shift + linear bias (f32)
        z = jnp.maximum(z, 0.0)                      # ReLU (f32, VPU)
        return z.astype(jnp.bfloat16)                # next layer's MXU operand

    h = layer(h, w1_ref, t1_ref)
    h = layer(h, w2_ref, t2_ref)
    h = layer(h, w3_ref, t3_ref)
    h = layer(h, w4_ref, t4_ref)
    h = layer(h, w5_ref, t5_ref)

    # final linear + softmax along the class (last) axis; padded classes carry -1e30 bias
    logits = jnp.dot(h, w6_ref[...], preferred_element_type=jnp.float32) + b6_ref[...]
    m = jnp.max(logits, axis=-1, keepdims=True)
    e = jnp.exp(logits - m)
    denom = jnp.sum(e, axis=-1, keepdims=True)
    out_ref[...] = e * pl.reciprocal(denom, approx=True)


def neural_net_forward(x, params, *, tm=None):
    """x: (B, 66) float32. params: dict produced by init_params(). Returns (B, 3) softmax."""
    B, F = x.shape
    assert F == DIMS[0]

    # ---- fold BatchNorm (eval, running stats) + Linear bias; fold scale into W; cast bf16 ----
    ws, ts = [], []
    for i in range(1, 6):
        w = params[f"w{i}"]                          # (in, out) f32
        b = params[f"b{i}"]                          # (out,)
        gamma = params[f"bn{i}_gamma"]
        beta = params[f"bn{i}_beta"]
        mean = params[f"bn{i}_mean"]
        var = params[f"bn{i}_var"]
        scale = gamma / jnp.sqrt(var + EPS)          # (out,)
        shift = beta + (b - mean) * scale            # (out,)  includes linear bias
        w_fold = w * scale[None, :]                  # exact fold of BN scale into weights
        if i == 1:
            w_fold = jnp.pad(w_fold, ((0, IN_PAD - DIMS[0]), (0, 0)))
        ws.append(w_fold.astype(jnp.bfloat16))
        ts.append(shift.reshape(1, -1).astype(jnp.float32))

    w6 = jnp.pad(params["w6"], ((0, 0), (0, OUT_PAD - DIMS[-1]))).astype(jnp.bfloat16)
    b6 = jnp.concatenate(
        [params["b6"].astype(jnp.float32),
         jnp.full((OUT_PAD - DIMS[-1],), NEG_BIG, jnp.float32)]).reshape(1, -1)

    # ---- batch tiling: large batches use 256-512 wide tiles, small batches round up to 8 ----
    if tm is None:
        if B >= 512:
            tm = 512
        elif B >= 256:
            tm = 256
        else:
            tm = max(8, ((B + 7) // 8) * 8)
    Bp = ((B + tm - 1) // tm) * tm
    # cast x to bf16 in the wrapper: halves batch DMA bytes; MXU rounds to bf16 regardless
    xp = jnp.pad(x, ((0, Bp - B), (0, IN_PAD - F))).astype(jnp.bfloat16)

    def const_spec(arr):
        # weights/shifts: same block every grid step -> stays VMEM-resident, DMA'd once
        return pl.BlockSpec(arr.shape, lambda i: (0, 0))

    in_specs = [pl.BlockSpec((tm, IN_PAD), lambda i: (i, 0))]
    kernel_args = [xp]
    for li in range(5):
        in_specs += [const_spec(ws[li]), const_spec(ts[li])]
        kernel_args += [ws[li], ts[li]]
    in_specs += [const_spec(w6), const_spec(b6)]
    kernel_args += [w6, b6]

    out = pl.pallas_call(
        _mlp_kernel,
        out_shape=jax.ShapeDtypeStruct((Bp, OUT_PAD), jnp.float32),
        grid=(Bp // tm,),
        in_specs=in_specs,
        out_specs=pl.BlockSpec((tm, OUT_PAD), lambda i: (i, 0)),
        compiler_params=pltpu.CompilerParams(
            dimension_semantics=("parallel",),       # shards batch tiles across v7x's 2 TCs
            vmem_limit_bytes=32 * 1024 * 1024),
    )(*kernel_args)

    return out[:B, :DIMS[-1]]


def init_params(key):
    params = {}
    keys = jax.random.split(key, 12)
    for i in range(6):
        fan_in, fan_out = DIMS[i], DIMS[i + 1]
        bound = 1.0 / jnp.sqrt(jnp.float32(fan_in))
        params[f"w{i+1}"] = jax.random.uniform(
            keys[2 * i], (fan_in, fan_out), jnp.float32, -bound, bound)
        params[f"b{i+1}"] = jax.random.uniform(
            keys[2 * i + 1], (fan_out,), jnp.float32, -bound, bound)
    # BatchNorm params/stats for layers 1..5 (deterministic, non-trivial)
    for i in range(1, 6):
        n = DIMS[i]
        idx = jnp.arange(n, dtype=jnp.float32)
        params[f"bn{i}_gamma"] = 1.0 + 0.01 * jnp.sin(idx)
        params[f"bn{i}_beta"] = 0.05 * jnp.cos(idx)
        params[f"bn{i}_mean"] = 0.02 * jnp.sin(0.5 * idx)
        params[f"bn{i}_var"] = 1.0 + 0.1 * jnp.abs(jnp.cos(0.3 * idx))
    return params


def reference_forward(x, params):
    """Pure-JAX f32 reference of the PyTorch forward (eval-mode BN)."""
    h = x
    for i in range(1, 6):
        z = h @ params[f"w{i}"] + params[f"b{i}"]
        z = (z - params[f"bn{i}_mean"]) / jnp.sqrt(params[f"bn{i}_var"] + EPS)
        z = z * params[f"bn{i}_gamma"] + params[f"bn{i}_beta"]
        h = jnp.maximum(z, 0.0)
    logits = h @ params["w6"] + params["b6"]
    return jax.nn.softmax(logits, axis=1)


if __name__ == "__main__":
    key = jax.random.PRNGKey(0)
    pkey, xkey = jax.random.split(key)
    params = init_params(pkey)

    B = 8
    x = jax.random.normal(xkey, (B, 66), dtype=jnp.float32)

    out = neural_net_forward(x, params)
    out = jax.block_until_ready(out)

    assert out.shape == (B, 3)
    assert bool(jnp.all(jnp.isfinite(out)))
    # softmax rows sum to 1 (approx reciprocal -> loose tolerance)
    assert jnp.allclose(jnp.sum(out, axis=1), jnp.ones((B,)), atol=1e-2)
    # matches pure-JAX f32 reference within bf16-matmul tolerance
    ref = reference_forward(x, params)
    assert jnp.allclose(out, ref, atol=0.1)
    print("KERNEL_OK")
</pallas_src>

<mosaic_0001>
module attributes {stable_mosaic.version = 11 : i64} {
  func.func @_mlp_kernel(%arg0: i32, %arg1: memref<8x128xbf16, #tpu.memory_space<vmem>>, %arg2: memref<128x128xbf16, #tpu.memory_space<vmem>>, %arg3: memref<1x128xf32, #tpu.memory_space<vmem>>, %arg4: memref<128x256xbf16, #tpu.memory_space<vmem>>, %arg5: memref<1x256xf32, #tpu.memory_space<vmem>>, %arg6: memref<256x512xbf16, #tpu.memory_space<vmem>>, %arg7: memref<1x512xf32, #tpu.memory_space<vmem>>, %arg8: memref<512x1024xbf16, #tpu.memory_space<vmem>>, %arg9: memref<1x1024xf32, #tpu.memory_space<vmem>>, %arg10: memref<1024x128xbf16, #tpu.memory_space<vmem>>, %arg11: memref<1x128xf32, #tpu.memory_space<vmem>>, %arg12: memref<128x128xbf16, #tpu.memory_space<vmem>>, %arg13: memref<1x128xf32, #tpu.memory_space<vmem>>, %arg14: memref<8x128xf32, #tpu.memory_space<vmem>>) attributes {dimension_semantics = [#tpu.dimension_semantics<parallel>], iteration_bounds = array<i64: 1>, scalar_prefetch = 0 : i64, scratch_operands = 0 : i64, tpu.core_type = #tpu.core_type<tc>, window_params = [{transform_indices = @transform_0, window_bounds = array<i64: 8, 128>}, {pipeline_mode = #tpu.pipeline_mode<synchronous>, transform_indices = @transform_1, window_bounds = array<i64: 128, 128>}, {pipeline_mode = #tpu.pipeline_mode<synchronous>, transform_indices = @transform_2, window_bounds = array<i64: 1, 128>}, {pipeline_mode = #tpu.pipeline_mode<synchronous>, transform_indices = @transform_3, window_bounds = array<i64: 128, 256>}, {pipeline_mode = #tpu.pipeline_mode<synchronous>, transform_indices = @transform_4, window_bounds = array<i64: 1, 256>}, {pipeline_mode = #tpu.pipeline_mode<synchronous>, transform_indices = @transform_5, window_bounds = array<i64: 256, 512>}, {pipeline_mode = #tpu.pipeline_mode<synchronous>, transform_indices = @transform_6, window_bounds = array<i64: 1, 512>}, {pipeline_mode = #tpu.pipeline_mode<synchronous>, transform_indices = @transform_7, window_bounds = array<i64: 512, 1024>}, {pipeline_mode = #tpu.pipeline_mode<synchronous>, transform_indices = @transform_8, window_bounds = array<i64: 1, 1024>}, {pipeline_mode = #tpu.pipeline_mode<synchronous>, transform_indices = @transform_9, window_bounds = array<i64: 1024, 128>}, {pipeline_mode = #tpu.pipeline_mode<synchronous>, transform_indices = @transform_10, window_bounds = array<i64: 1, 128>}, {pipeline_mode = #tpu.pipeline_mode<synchronous>, transform_indices = @transform_11, window_bounds = array<i64: 128, 128>}, {pipeline_mode = #tpu.pipeline_mode<synchronous>, transform_indices = @transform_12, window_bounds = array<i64: 1, 128>}, {transform_indices = @transform_13, window_bounds = array<i64: 8, 128>}]} {
    %c0 = arith.constant 0 : index
    %c0_0 = arith.constant 0 : index
    %0 = vector.load %arg1[%c0, %c0_0] : memref<8x128xbf16, #tpu.memory_space<vmem>>, vector<8x128xbf16>
    %c0_1 = arith.constant 0 : index
    %c0_2 = arith.constant 0 : index
    %1 = vector.load %arg2[%c0_1, %c0_2] : memref<128x128xbf16, #tpu.memory_space<vmem>>, vector<128x128xbf16>
    %cst = arith.constant dense<0.000000e+00> : vector<8x128xf32>
    %2 = tpu.matmul %0, %1, %cst {dimension_numbers = #tpu.dot_dimension_numbers<[1], [0], [0], [1], [0, 0, 1, 1], [], []>} : vector<8x128xbf16>, vector<128x128xbf16>, vector<8x128xf32> -> vector<8x128xf32>
    %c0_3 = arith.constant 0 : index
    %c0_4 = arith.constant 0 : index
    %3 = vector.load %arg3[%c0_3, %c0_4] : memref<1x128xf32, #tpu.memory_space<vmem>>, vector<1x128xf32>
    %4 = vector.broadcast %3 : vector<1x128xf32> to vector<8x128xf32>
    %5 = arith.addf %2, %4 : vector<8x128xf32>
    %cst_5 = arith.constant 0.000000e+00 : f32
    %6 = vector.broadcast %cst_5 : f32 to vector<8x128xf32>
    %7 = arith.maximumf %5, %6 : vector<8x128xf32>
    %8 = arith.truncf %7 : vector<8x128xf32> to vector<8x128xbf16>
    %c0_6 = arith.constant 0 : index
    %c0_7 = arith.constant 0 : index
    %9 = vector.load %arg4[%c0_6, %c0_7] : memref<128x256xbf16, #tpu.memory_space<vmem>>, vector<128x256xbf16>
    %cst_8 = arith.constant dense<0.000000e+00> : vector<8x256xf32>
    %10 = tpu.matmul %8, %9, %cst_8 {dimension_numbers = #tpu.dot_dimension_numbers<[1], [0], [0], [1], [0, 0, 1, 1], [], []>} : vector<8x128xbf16>, vector<128x256xbf16>, vector<8x256xf32> -> vector<8x256xf32>
    %c0_9 = arith.constant 0 : index
    %c0_10 = arith.constant 0 : index
    %11 = vector.load %arg5[%c0_9, %c0_10] : memref<1x256xf32, #tpu.memory_space<vmem>>, vector<1x256xf32>
    %12 = vector.broadcast %11 : vector<1x256xf32> to vector<8x256xf32>
    %13 = arith.addf %10, %12 : vector<8x256xf32>
    %cst_11 = arith.constant 0.000000e+00 : f32
    %14 = vector.broadcast %cst_11 : f32 to vector<8x256xf32>
    %15 = arith.maximumf %13, %14 : vector<8x256xf32>
    %16 = arith.truncf %15 : vector<8x256xf32> to vector<8x256xbf16>
    %c0_12 = arith.constant 0 : index
    %c0_13 = arith.constant 0 : index
    %17 = vector.load %arg6[%c0_12, %c0_13] : memref<256x512xbf16, #tpu.memory_space<vmem>>, vector<256x512xbf16>
    %cst_14 = arith.constant dense<0.000000e+00> : vector<8x512xf32>
    %18 = tpu.matmul %16, %17, %cst_14 {dimension_numbers = #tpu.dot_dimension_numbers<[1], [0], [0], [1], [0, 0, 1, 1], [], []>} : vector<8x256xbf16>, vector<256x512xbf16>, vector<8x512xf32> -> vector<8x512xf32>
    %c0_15 = arith.constant 0 : index
    %c0_16 = arith.constant 0 : index
    %19 = vector.load %arg7[%c0_15, %c0_16] : memref<1x512xf32, #tpu.memory_space<vmem>>, vector<1x512xf32>
    %20 = vector.broadcast %19 : vector<1x512xf32> to vector<8x512xf32>
    %21 = arith.addf %18, %20 : vector<8x512xf32>
    %cst_17 = arith.constant 0.000000e+00 : f32
    %22 = vector.broadcast %cst_17 : f32 to vector<8x512xf32>
    %23 = arith.maximumf %21, %22 : vector<8x512xf32>
    %24 = arith.truncf %23 : vector<8x512xf32> to vector<8x512xbf16>
    %c0_18 = arith.constant 0 : index
    %c0_19 = arith.constant 0 : index
    %25 = vector.load %arg8[%c0_18, %c0_19] : memref<512x1024xbf16, #tpu.memory_space<vmem>>, vector<512x1024xbf16>
    %cst_20 = arith.constant dense<0.000000e+00> : vector<8x1024xf32>
    %26 = tpu.matmul %24, %25, %cst_20 {dimension_numbers = #tpu.dot_dimension_numbers<[1], [0], [0], [1], [0, 0, 1, 1], [], []>} : vector<8x512xbf16>, vector<512x1024xbf16>, vector<8x1024xf32> -> vector<8x1024xf32>
    %c0_21 = arith.constant 0 : index
    %c0_22 = arith.constant 0 : index
    %27 = vector.load %arg9[%c0_21, %c0_22] : memref<1x1024xf32, #tpu.memory_space<vmem>>, vector<1x1024xf32>
    %28 = vector.broadcast %27 : vector<1x1024xf32> to vector<8x1024xf32>
    %29 = arith.addf %26, %28 : vector<8x1024xf32>
    %cst_23 = arith.constant 0.000000e+00 : f32
    %30 = vector.broadcast %cst_23 : f32 to vector<8x1024xf32>
    %31 = arith.maximumf %29, %30 : vector<8x1024xf32>
    %32 = arith.truncf %31 : vector<8x1024xf32> to vector<8x1024xbf16>
    %c0_24 = arith.constant 0 : index
    %c0_25 = arith.constant 0 : index
    %33 = vector.load %arg10[%c0_24, %c0_25] : memref<1024x128xbf16, #tpu.memory_space<vmem>>, vector<1024x128xbf16>
    %cst_26 = arith.constant dense<0.000000e+00> : vector<8x128xf32>
    %34 = tpu.matmul %32, %33, %cst_26 {dimension_numbers = #tpu.dot_dimension_numbers<[1], [0], [0], [1], [0, 0, 1, 1], [], []>} : vector<8x1024xbf16>, vector<1024x128xbf16>, vector<8x128xf32> -> vector<8x128xf32>
    %c0_27 = arith.constant 0 : index
    %c0_28 = arith.constant 0 : index
    %35 = vector.load %arg11[%c0_27, %c0_28] : memref<1x128xf32, #tpu.memory_space<vmem>>, vector<1x128xf32>
    %36 = vector.broadcast %35 : vector<1x128xf32> to vector<8x128xf32>
    %37 = arith.addf %34, %36 : vector<8x128xf32>
    %cst_29 = arith.constant 0.000000e+00 : f32
    %38 = vector.broadcast %cst_29 : f32 to vector<8x128xf32>
    %39 = arith.maximumf %37, %38 : vector<8x128xf32>
    %40 = arith.truncf %39 : vector<8x128xf32> to vector<8x128xbf16>
    %c0_30 = arith.constant 0 : index
    %c0_31 = arith.constant 0 : index
    %41 = vector.load %arg12[%c0_30, %c0_31] : memref<128x128xbf16, #tpu.memory_space<vmem>>, vector<128x128xbf16>
    %cst_32 = arith.constant dense<0.000000e+00> : vector<8x128xf32>
    %42 = tpu.matmul %40, %41, %cst_32 {dimension_numbers = #tpu.dot_dimension_numbers<[1], [0], [0], [1], [0, 0, 1, 1], [], []>} : vector<8x128xbf16>, vector<128x128xbf16>, vector<8x128xf32> -> vector<8x128xf32>
    %c0_33 = arith.constant 0 : index
    %c0_34 = arith.constant 0 : index
    %43 = vector.load %arg13[%c0_33, %c0_34] : memref<1x128xf32, #tpu.memory_space<vmem>>, vector<1x128xf32>
    %44 = vector.broadcast %43 : vector<1x128xf32> to vector<8x128xf32>
    %45 = arith.addf %42, %44 : vector<8x128xf32>
    %cst_35 = arith.constant dense<0xFF800000> : vector<8xf32>
    %46 = vector.multi_reduction <maximumf>, %45, %cst_35 [1] : vector<8x128xf32> to vector<8xf32>
    %47 = vector.shape_cast %46 : vector<8xf32> to vector<8x1xf32>
    %48 = vector.broadcast %47 : vector<8x1xf32> to vector<8x128xf32>
    %49 = arith.subf %45, %48 : vector<8x128xf32>
    %50 = math.exp %49 : vector<8x128xf32>
    %cst_36 = arith.constant dense<0.000000e+00> : vector<8xf32>
    %51 = vector.multi_reduction <add>, %50, %cst_36 [1] : vector<8x128xf32> to vector<8xf32>
    %52 = vector.shape_cast %51 : vector<8xf32> to vector<8x1xf32>
    %53 = tpu.reciprocal %52 {approx = true} : vector<8x1xf32> -> vector<8x1xf32>
    %54 = vector.broadcast %53 : vector<8x1xf32> to vector<8x128xf32>
    %55 = arith.mulf %50, %54 : vector<8x128xf32>
    %c0_37 = arith.constant 0 : index
    %c0_38 = arith.constant 0 : index
    %56 = vector.load %arg14[%c0_37, %c0_38] : memref<8x128xf32, #tpu.memory_space<vmem>>, vector<8x128xf32>
    tpu.vector_store %arg14[%c0_37, %c0_38], %55 {strides = array<i32>} : memref<8x128xf32, #tpu.memory_space<vmem>>, vector<8x128xf32>,
    return
  }
  func.func @transform_0(%arg0: i32) -> (i32, i32) {
    %c0_i32 = arith.constant 0 : i32
    %c0_i32_0 = arith.constant 0 : i32
    return %arg0, %c0_i32 : i32, i32
  }
  func.func @transform_1(%arg0: i32) -> (i32, i32) {
    %c0_i32 = arith.constant 0 : i32
    %c0_i32_0 = arith.constant 0 : i32
    %c0_i32_1 = arith.constant 0 : i32
    return %c0_i32, %c0_i32_0 : i32, i32
  }
  func.func @transform_2(%arg0: i32) -> (i32, i32) {
    %c0_i32 = arith.constant 0 : i32
    %c0_i32_0 = arith.constant 0 : i32
    %c0_i32_1 = arith.constant 0 : i32
    return %c0_i32, %c0_i32_0 : i32, i32
  }
  func.func @transform_3(%arg0: i32) -> (i32, i32) {
    %c0_i32 = arith.constant 0 : i32
    %c0_i32_0 = arith.constant 0 : i32
    %c0_i32_1 = arith.constant 0 : i32
    return %c0_i32, %c0_i32_0 : i32, i32
  }
  func.func @transform_4(%arg0: i32) -> (i32, i32) {
    %c0_i32 = arith.constant 0 : i32
    %c0_i32_0 = arith.constant 0 : i32
    %c0_i32_1 = arith.constant 0 : i32
    return %c0_i32, %c0_i32_0 : i32, i32
  }
  func.func @transform_5(%arg0: i32) -> (i32, i32) {
    %c0_i32 = arith.constant 0 : i32
    %c0_i32_0 = arith.constant 0 : i32
    %c0_i32_1 = arith.constant 0 : i32
    return %c0_i32, %c0_i32_0 : i32, i32
  }
  func.func @transform_6(%arg0: i32) -> (i32, i32) {
    %c0_i32 = arith.constant 0 : i32
    %c0_i32_0 = arith.constant 0 : i32
    %c0_i32_1 = arith.constant 0 : i32
    return %c0_i32, %c0_i32_0 : i32, i32
  }
  func.func @transform_7(%arg0: i32) -> (i32, i32) {
    %c0_i32 = arith.constant 0 : i32
    %c0_i32_0 = arith.constant 0 : i32
    %c0_i32_1 = arith.constant 0 : i32
    return %c0_i32, %c0_i32_0 : i32, i32
  }
  func.func @transform_8(%arg0: i32) -> (i32, i32) {
    %c0_i32 = arith.constant 0 : i32
    %c0_i32_0 = arith.constant 0 : i32
    %c0_i32_1 = arith.constant 0 : i32
    return %c0_i32, %c0_i32_0 : i32, i32
  }
  func.func @transform_9(%arg0: i32) -> (i32, i32) {
    %c0_i32 = arith.constant 0 : i32
    %c0_i32_0 = arith.constant 0 : i32
    %c0_i32_1 = arith.constant 0 : i32
    return %c0_i32, %c0_i32_0 : i32, i32
  }
  func.func @transform_10(%arg0: i32) -> (i32, i32) {
    %c0_i32 = arith.constant 0 : i32
    %c0_i32_0 = arith.constant 0 : i32
    %c0_i32_1 = arith.constant 0 : i32
    return %c0_i32, %c0_i32_0 : i32, i32
  }
  func.func @transform_11(%arg0: i32) -> (i32, i32) {
    %c0_i32 = arith.constant 0 : i32
    %c0_i32_0 = arith.constant 0 : i32
    %c0_i32_1 = arith.constant 0 : i32
    return %c0_i32, %c0_i32_0 : i32, i32
  }
  func.func @transform_12(%arg0: i32) -> (i32, i32) {
    %c0_i32 = arith.constant 0 : i32
    %c0_i32_0 = arith.constant 0 : i32
    %c0_i32_1 = arith.constant 0 : i32
    return %c0_i32, %c0_i32_0 : i32, i32
  }
  func.func @transform_13(%arg0: i32) -> (i32, i32) {
    %c0_i32 = arith.constant 0 : i32
    %c0_i32_0 = arith.constant 0 : i32
    return %arg0, %c0_i32 : i32, i32
  }
}

</mosaic_0001>

<bundles_post_ra>
// kernel: tpu_custom_call.1
= control target key start
LH: loop header
LB: loop body
LE: loop exit
PB: predicated region body
PF: predicated region fallthrough
CT: control target
= control target key end

     0   :  { %18 = vsyncpa [#allocation3], 0  ;;  %s4945_s0 = inlined_call_operand.hbm [shape: bf16[8,128], index: 0, kind: input, shape index: {}]   ;;  %s4946_s1 = inlined_call_operand.hbm [shape: bf16[128,128], index: 1, kind: input, shape index: {}]   ;;  %s4947_s2 = inlined_call_operand.vmem [shape: f32[1,128], index: 2, kind: input, shape index: {}]   ;;  %s4948_s3 = inlined_call_operand.hbm [shape: bf16[128,256], index: 3, kind: input, shape index: {}]   ;;  %s4949_s4 = inlined_call_operand.vmem [shape: f32[1,256], index: 4, kind: input, shape index: {}]   ;;  %s4950_s5 = inlined_call_operand.hbm [shape: bf16[256,512], index: 5, kind: input, shape index: {}]   ;;  %s4951_s6 = inlined_call_operand.vmem [shape: f32[1,512], index: 6, kind: input, shape index: {}]   ;;  %s4952_s7 = inlined_call_operand.hbm [shape: bf16[512,1024], index: 7, kind: input, shape index: {}]   ;;  %s4953_s8 = inlined_call_operand.vmem [shape: f32[1,1024], index: 8, kind: input, shape index: {}]   ;;  %s4954_s9 = inlined_call_operand.hbm [shape: bf16[1024,128], index: 9, kind: input, shape index: {}]   ;;  %s4955_s10 = inlined_call_operand.vmem [shape: f32[1,128], index: 10, kind: input, shape index: {}]   ;;  %s4956_s11 = inlined_call_operand.hbm [shape: bf16[128,128], index: 11, kind: input, shape index: {}]   ;;  %s4957_s12 = inlined_call_operand.vmem [shape: f32[1,128], index: 12, kind: input, shape index: {}]   ;;  %s4958_s13 = inlined_call_operand.hbm [shape: f32[8,128], index: 13, kind: output, shape index: {}]  }
   0x1   :  { %19 = vsyncpa [#allocation6], 0 }
   0x2   :  { %20 = vsyncpa [#allocation9], 0 }
   0x3   :  { %21 = vsyncpa [#allocation12], 0 }
   0x4   :  { %22 = vsyncpa [#allocation4], 0  ;;  %s4642_s25 = smov [#allocation5]   ;;  %s4456_s29 = scalar_lea.hbm %s4946_s1, 1024 }
   0x5   :  { %s38_s26 = sshll.u32 %s4642_s25, 4  ;;  %p4457_p0 = scmp.ne.s32.totalorder %s4946_s1, %s4456_s29  ;;  %s39_s26 = int_to_ptr.vmem [resolvable:$true] %s38_s26 }
   0x6   :  { %p4460_p1 = scmp.lt.u32.totalorder %s4456_s29, %s4946_s1 }
   0x8   :  { %p4462_p2 = pnand %p4460_p1, %p4457_p0 }
   0xa   :  { %4465 = shalt.err (!%p4462_p2)
}
   0xb   :  { %s4466_s17 = scalar_lea.vmem %s39_s26, 1024  ;;  %p4471_p4 = scmp.lt.s32.totalorder %s39_s26, %s39_s26 }
   0xc   :  { %p4467_p3 = scmp.ne.s32.totalorder %s39_s26, %s4466_s17  ;;  %p4472_p5 = scmp.lt.s32.totalorder %s4466_s17, %s4466_s17 }
   0xe   :  { %p4473_p6 = por %p4472_p5, %p4471_p4 }
  0x10   :  { %p4474_p7 = pnand %p4473_p6, %p4467_p3 }
  0x12   :  { %4477 = shalt.err (!%p4474_p7)
}
  0x13   :  { %s4643_s18 = smov 64   ;;  %s4644_s19 = smov 4  }
  0x14   :  { %44 = dma.hbm_to_vmem [thread:$0]  %s4946_s1, 1024, %s39_s26, [#allocation6], %s4643_s18, %s4643_s18, %s4644_s19  }
  0x15   :  { %s4645_s22 = smov [#allocation8]   ;;  %s4478_s27 = scalar_lea.hbm %s4950_s5, 8192 }
  0x16   :  { %s66_s23 = sshll.u32 %s4645_s22, 4  ;;  %p4479_p8 = scmp.ne.s32.totalorder %s4950_s5, %s4478_s27  ;;  %s67_s23 = int_to_ptr.vmem [resolvable:$true] %s66_s23 }
  0x17   :  { %p4482_p9 = scmp.lt.u32.totalorder %s4478_s27, %s4950_s5 }
  0x19   :  { %p4484_p10 = pnand %p4482_p9, %p4479_p8 }
  0x1b   :  { %4487 = shalt.err (!%p4484_p10)
}
  0x1c   :  { %s4488_s15 = scalar_lea.vmem %s67_s23, 8192  ;;  %p4493_p12 = scmp.lt.s32.totalorder %s67_s23, %s67_s23 }
  0x1d   :  { %p4489_p11 = scmp.ne.s32.totalorder %s67_s23, %s4488_s15  ;;  %p4494_p13 = scmp.lt.s32.totalorder %s4488_s15, %s4488_s15 }
  0x1f   :  { %p4495_p0 = por %p4494_p13, %p4493_p12 }
  0x21   :  { %p4496_p1 = pnand %p4495_p0, %p4489_p11 }
  0x23   :  { %4499 = shalt.err (!%p4496_p1)
}
  0x24   :  { %s4646_s1 = smov 256   ;;  %s4647_s26 = smov 16  }
  0x25   :  { %72 = dma.hbm_to_vmem [thread:$0]  %s4950_s5, 8192, %s67_s23, [#allocation9], %s4646_s1, %s4646_s1, %s4647_s26  }
  0x26   :  { %s4648_s20 = smov [#allocation11]   ;;  %s4649_s22 = smov [#allocation2]  }
  0x27   :  { %s94_s21 = sshll.u32 %s4648_s20, 4  ;;  %s29_s24 = sshll.u32 %s4649_s22, 4  ;;  %s95_s21 = int_to_ptr.vmem [resolvable:$true] %s94_s21  ;;  %s30_s24 = int_to_ptr.vmem [resolvable:$true] %s29_s24 }
  0x28   :  { %s4500_s28 = scalar_lea.hbm %s4954_s9, 8192 }
  0x29   :  { %p4501_p2 = scmp.ne.s32.totalorder %s4954_s9, %s4500_s28  ;;  %p4504_p3 = scmp.lt.u32.totalorder %s4500_s28, %s4954_s9 }
  0x2b   :  { %p4506_p4 = pnand %p4504_p3, %p4501_p2 }
  0x2d   :  { %4509 = shalt.err (!%p4506_p4)
}
  0x2e   :  { %s4510_s5 = scalar_lea.vmem %s95_s21, 8192  ;;  %p4515_p6 = scmp.lt.s32.totalorder %s95_s21, %s95_s21 }
  0x2f   :  { %p4511_p5 = scmp.ne.s32.totalorder %s95_s21, %s4510_s5  ;;  %p4516_p7 = scmp.lt.s32.totalorder %s4510_s5, %s4510_s5 }
  0x31   :  { %p4517_p8 = por %p4516_p7, %p4515_p6 }
  0x33   :  { %p4518_p9 = pnand %p4517_p8, %p4511_p5 }
  0x35   :  { %4521 = shalt.err (!%p4518_p9)
}
  0x36   :  { %100 = dma.hbm_to_vmem [thread:$0]  %s4954_s9, 8192, %s95_s21, [#allocation12], %s4643_s18, %s4643_s18, %s4644_s19  }
  0x37   :  { %s4522_s17 = scalar_lea.hbm %s4945_s0, 64 }
  0x38   :  { %p4523_p10 = scmp.ne.s32.totalorder %s4945_s0, %s4522_s17  ;;  %p4526_p11 = scmp.lt.u32.totalorder %s4522_s17, %s4945_s0 }
  0x3a   :  { %p4528_p12 = pnand %p4526_p11, %p4523_p10 }
  0x3c   :  { %4531 = shalt.err (!%p4528_p12)
}
  0x3d   :  { %s4532_s28 = scalar_lea.vmem %s30_s24, 64  ;;  %p4537_p0 = scmp.lt.s32.totalorder %s30_s24, %s30_s24 }
  0x3e   :  { %p4533_p13 = scmp.ne.s32.totalorder %s30_s24, %s4532_s28  ;;  %p4538_p1 = scmp.lt.s32.totalorder %s4532_s28, %s4532_s28 }
  0x40   :  { %p4539_p2 = por %p4538_p1, %p4537_p0 }
  0x42   :  { %p4540_p3 = pnand %p4539_p2, %p4533_p13 }
  0x44   :  { %4543 = shalt.err (!%p4540_p3)
}
  0x45   :  { %32 = dma.hbm_to_vmem [thread:$0]  %s4945_s0, 64, %s30_s24, [#allocation3]  }
  0x46   :  { %s4650_s29 = smov [#allocation7]   ;;  %s4544_s5 = scalar_lea.hbm %s4948_s3, 2048 }
  0x47   :  { %s52_s30 = sshll.u32 %s4650_s29, 4  ;;  %p4545_p4 = scmp.ne.s32.totalorder %s4948_s3, %s4544_s5  ;;  %s53_s30 = int_to_ptr.vmem [resolvable:$true] %s52_s30 }
  0x48   :  { %p4548_p5 = scmp.lt.u32.totalorder %s4544_s5, %s4948_s3 }
  0x4a   :  { %p4550_p6 = pnand %p4548_p5, %p4545_p4 }
  0x4c   :  { %4553 = shalt.err (!%p4550_p6)
}
  0x4d   :  { %s4554_s17 = scalar_lea.vmem %s53_s30, 2048  ;;  %p4559_p8 = scmp.lt.s32.totalorder %s53_s30, %s53_s30 }
  0x4e   :  { %p4555_p7 = scmp.ne.s32.totalorder %s53_s30, %s4554_s17  ;;  %p4560_p9 = scmp.lt.s32.totalorder %s4554_s17, %s4554_s17 }
  0x50   :  { %p4561_p10 = por %p4560_p9, %p4559_p8 }
  0x52   :  { %p4562_p11 = pnand %p4561_p10, %p4555_p7 }
  0x54   :  { %4565 = shalt.err (!%p4562_p11)
}
  0x55   :  { %s4651_s0 = smov 128   ;;  %s4652_s24 = smov 8  }
  0x56   :  { %58 = dma.hbm_to_vmem [thread:$0]  %s4948_s3, 2048, %s53_s30, [#allocation6], %s4651_s0, %s4651_s0, %s4652_s24  }
  0x57   :  { %s4653_s25 = smov [#allocation10]   ;;  %s4566_s21 = scalar_lea.hbm %s4952_s7, 32768 }
  0x58   :  { %s80_s27 = sshll.u32 %s4653_s25, 4  ;;  %p4567_p12 = scmp.ne.s32.totalorder %s4952_s7, %s4566_s21  ;;  %s81_s27 = int_to_ptr.vmem [resolvable:$true] %s80_s27 }
  0x59   :  { %p4570_p13 = scmp.lt.u32.totalorder %s4566_s21, %s4952_s7 }
  0x5b   :  { %p4572_p0 = pnand %p4570_p13, %p4567_p12 }
  0x5d   :  { %4575 = shalt.err (!%p4572_p0)
}
  0x5e   :  { %s4576_s23 = scalar_lea.vmem %s81_s27, 32768  ;;  %p4581_p2 = scmp.lt.s32.totalorder %s81_s27, %s81_s27 }
  0x5f   :  { %p4577_p1 = scmp.ne.s32.totalorder %s81_s27, %s4576_s23  ;;  %p4582_p3 = scmp.lt.s32.totalorder %s4576_s23, %s4576_s23 }
  0x61   :  { %p4583_p4 = por %p4582_p3, %p4581_p2 }
  0x63   :  { %p4584_p5 = pnand %p4583_p4, %p4577_p1 }
  0x65   :  { %4587 = shalt.err (!%p4584_p5)
}
  0x66   :  { %s4654_s3 = smov 512   ;;  %s4655_s30 = smov 32  }
  0x67   :  { %86 = dma.hbm_to_vmem [thread:$0]  %s4952_s7, 32768, %s81_s27, [#allocation9], %s4654_s3, %s4654_s3, %s4655_s30  }
  0x68   :  { %s4656_s16 = smov [#allocation13]   ;;  %s4588_s20 = scalar_lea.hbm %s4956_s11, 1024 }
  0x69   :  { %s108_s17 = sshll.u32 %s4656_s16, 4  ;;  %p4589_p6 = scmp.ne.s32.totalorder %s4956_s11, %s4588_s20  ;;  %s109_s17 = int_to_ptr.vmem [resolvable:$true] %s108_s17 }
  0x6a   :  { %p4592_p7 = scmp.lt.u32.totalorder %s4588_s20, %s4956_s11 }
  0x6c   :  { %p4594_p8 = pnand %p4592_p7, %p4589_p6 }
  0x6e   :  { %4597 = shalt.err (!%p4594_p8)
}
  0x6f   :  { %s4598_s21 = scalar_lea.vmem %s109_s17, 1024  ;;  %p4603_p10 = scmp.lt.s32.totalorder %s109_s17, %s109_s17 }
  0x70   :  { %p4599_p9 = scmp.ne.s32.totalorder %s109_s17, %s4598_s21  ;;  %p4604_p11 = scmp.lt.s32.totalorder %s4598_s21, %s4598_s21 }
  0x72   :  { %p4605_p12 = por %p4604_p11, %p4603_p10 }
  0x74   :  { %p4606_p13 = pnand %p4605_p12, %p4599_p9 }
  0x76   :  { %4609 = shalt.err (!%p4606_p13)
}
  0x77   :  { %114 = dma.hbm_to_vmem [thread:$0]  %s4956_s11, 1024, %s109_s17, [#allocation12], %s4643_s18, %s4643_s18, %s4644_s19  }
  0x78   :  { %4632 = dma.done.wait [#allocation3], 64  }
  0x79   :  { %4633 = vsyncadd [#allocation3], 4294967232 }
  0x7a   :  { %4634 = dma.done.wait [#allocation6], 3072  }
  0x7b   :  { %4635 = vsyncadd [#allocation6], 4294964224 }
  0x7c   :  { %4636 = dma.done.wait [#allocation9], 40960  }
  0x7d   :  { %4637 = vsyncadd [#allocation9], 4294926336 }
  0x7e   :  { %4638 = dma.done.wait [#allocation12], 9216  }
  0x7f   :  { %4639 = vsyncadd [#allocation12], 4294958080  ;;  %v4657_v0 = vmov 0.0   ;;  %vm4658_vm0 = vmmov 0   ;;  %v4252_v1 = vld [vmem:[#allocation5] sm:$0xff]   ;;  %v4253_v2 = vld [vmem:[#allocation5 + $0x8] sm:$0xff]  }
  0x80   :  { %4169 = vmatprep.subr.bf16.mxu0 %v4657_v0  ;;  %4185 = vmatprep.mubr.msk.bf16.mxu0 %vm4658_vm0, %v4657_v0  ;;  %v4254_v3 = vld [vmem:[#allocation5 + $0x10] sm:$0xff]   ;;  %v4260_v4 = vld [vmem:[#allocation7 + $0x4] ss:$8 sps:$4 sm:$0xff]   ;;  %v4262_v5 = vld [vmem:[#allocation7] ss:$8 sps:$4 sm:$0xff]   ;;  %v4659_v26 = vmov 0  }
  0x81   :  { %4170 = vmatpush3.bf16.msra.mxu0 %v4252_v1  ;;  %v4255_v6 = vld [vmem:[#allocation5 + $0x18] sm:$0xff]   ;;  %361 = vmatprep.subr.bf16.mxu1 %v4260_v4  ;;  %v4266_v9 = vld [vmem:[#allocation7 + $0x24] ss:$8 sps:$4 sm:$0xff]   ;;  %v4268_v11 = vld [vmem:[#allocation7 + $0x20] ss:$8 sps:$4 sm:$0xff]   ;;  %s4660_s23 = smov [#allocation14]  }
  0x82   :  { %4171 = vmatprep.subr.bf16.mxu0 %v4657_v0  ;;  %v4263_v7 = vld [vmem:[#allocation7 + $0x14] ss:$8 sps:$4 sm:$0xff]   ;;  %362 = vmatpush1.bf16.msra.mxu1 %v4262_v5  ;;  %v4265_v8 = vld [vmem:[#allocation7 + $0x10] ss:$8 sps:$4 sm:$0xff]   ;;  %v4256_v10 = vld [vmem:[#allocation5 + $0x20] sm:$0xff]   ;;  %s3632_s3 = sshll.u32 %s4660_s23, 4  ;;  %s3633_s3 = int_to_ptr.vmem [resolvable:$true] %s3632_s3 }
  0x83   :  { %363 = vmatprep.subr.bf16.mxu1 %v4263_v7  ;;  %v4257_v12 = vld [vmem:[#allocation5 + $0x28] sm:$0xff]   ;;  %v4269_v13 = vld [vmem:[#allocation7 + $0x34] ss:$8 sps:$4 sm:$0xff]   ;;  %v4271_v14 = vld [vmem:[#allocation7 + $0x30] ss:$8 sps:$4 sm:$0xff]   ;;  %393 = vmatprep.mubr.bf16.mxu1 %v4659_v26  ;;  %p4615_p1 = scmp.lt.s32.totalorder %s3633_s3, %s3633_s3 }
  0x84   :  { %v4272_v15 = vld [vmem:[#allocation7 + $0x44] ss:$8 sps:$4 sm:$0xff]   ;;  %v4258_v16 = vld [vmem:[#allocation5 + $0x30] sm:$0xff]   ;;  %v4274_v17 = vld [vmem:[#allocation7 + $0x40] ss:$8 sps:$4 sm:$0xff]  }
  0x85   :  { %4172 = vmatpush3.bf16.msra.mxu0 %v4253_v2  ;;  %v4275_v18 = vld [vmem:[#allocation7 + $0x54] ss:$8 sps:$4 sm:$0xff]   ;;  %v4277_v20 = vld [vmem:[#allocation7 + $0x50] ss:$8 sps:$4 sm:$0xff]   ;;  %v4278_v21 = vld [vmem:[#allocation7 + $0x64] ss:$8 sps:$4 sm:$0xff]  }
  0x86   :  { %4173 = vmatprep.subr.bf16.mxu0 %v4657_v0  ;;  %364 = vmatpush1.bf16.msra.mxu1 %v4265_v8  ;;  %v4259_v19 = vld [vmem:[#allocation5 + $0x38] sm:$0xff]   ;;  %v4280_v23 = vld [vmem:[#allocation7 + $0x60] ss:$8 sps:$4 sm:$0xff]   ;;  %v4286_v28 = vld [vmem:[#allocation8 + $0x4] ss:$16 sps:$4 sm:$0xff]  }
  0x87   :  { %365 = vmatprep.subr.bf16.mxu1 %v4266_v9  ;;  %v139_v22 = vld [vmem:[#allocation2] sm:$0xf]  ;;  %v4283_v25 = vld [vmem:[#allocation7 + $0x70] ss:$8 sps:$4 sm:$0xff]   ;;  %v4292_v30 = vld [vmem:[#allocation8 + $0x24] ss:$16 sps:$4 sm:$0xff]  }
  0x88   :  { %v4281_v24 = vld [vmem:[#allocation7 + $0x74] ss:$8 sps:$4 sm:$0xff]   ;;  %v4284_v27 = vld [vmem:[#allocation8] ss:$16 sps:$4 sm:$0xff]   ;;  %v4287_v63 = vld [vmem:[#allocation8 + $0x8] ss:$16 sps:$4 sm:$0xff]  }
  0x89   :  { %4174 = vmatpush3.bf16.msra.mxu0 %v4254_v3  ;;  %v4289_v29 = vld [vmem:[#allocation8 + $0xc] ss:$16 sps:$4 sm:$0xff]   ;;  %v4290_v31 = vld [vmem:[#allocation8 + $0x20] ss:$16 sps:$4 sm:$0xff]   ;;  %v4298_v32 = vld [vmem:[#allocation8 + $0x44] ss:$16 sps:$4 sm:$0xff]  }
  0x8a   :  { %4175 = vmatprep.subr.bf16.mxu0 %v4657_v0  ;;  %366 = vmatpush1.bf16.msra.mxu1 %v4268_v11  ;;  %v4296_v33 = vld [vmem:[#allocation8 + $0x40] ss:$16 sps:$4 sm:$0xff]   ;;  %v4304_v34 = vld [vmem:[#allocation8 + $0x64] ss:$16 sps:$4 sm:$0xff]   ;;  %v4295_v2 = vld [vmem:[#allocation8 + $0x2c] ss:$16 sps:$4 sm:$0xff]  }
  0x8b   :  { %367 = vmatprep.subr.bf16.mxu1 %v4269_v13  ;;  %v4302_v35 = vld [vmem:[#allocation8 + $0x60] ss:$16 sps:$4 sm:$0xff]   ;;  %v4310_v36 = vld [vmem:[#allocation8 + $0x84] ss:$16 sps:$4 sm:$0xff]   ;;  %v4293_v3 = vld [vmem:[#allocation8 + $0x28] ss:$16 sps:$4 sm:$0xff]  }
  0x8c   :  { %v4308_v37 = vld [vmem:[#allocation8 + $0x80] ss:$16 sps:$4 sm:$0xff]   ;;  %v4316_v38 = vld [vmem:[#allocation8 + $0xa4] ss:$16 sps:$4 sm:$0xff]   ;;  %v4301_v4 = vld [vmem:[#allocation8 + $0x4c] ss:$16 sps:$4 sm:$0xff]  }
  0x8d   :  { %4176 = vmatpush3.bf16.msra.mxu0 %v4255_v6  ;;  %v4314_v39 = vld [vmem:[#allocation8 + $0xa0] ss:$16 sps:$4 sm:$0xff]   ;;  %v4322_v40 = vld [vmem:[#allocation8 + $0xc4] ss:$16 sps:$4 sm:$0xff]   ;;  %v4299_v5 = vld [vmem:[#allocation8 + $0x48] ss:$16 sps:$4 sm:$0xff]  }
  0x8e   :  { %4177 = vmatprep.subr.bf16.mxu0 %v4657_v0  ;;  %368 = vmatpush1.bf16.msra.mxu1 %v4271_v14  ;;  %v4320_v41 = vld [vmem:[#allocation8 + $0xc0] ss:$16 sps:$4 sm:$0xff]   ;;  %v4328_v42 = vld [vmem:[#allocation8 + $0xe4] ss:$16 sps:$4 sm:$0xff]   ;;  %v4307_v6 = vld [vmem:[#allocation8 + $0x6c] ss:$16 sps:$4 sm:$0xff]  }
  0x8f   :  { %369 = vmatprep.subr.bf16.mxu1 %v4272_v15  ;;  %v4326_v43 = vld [vmem:[#allocation8 + $0xe0] ss:$16 sps:$4 sm:$0xff]   ;;  %v4334_v44 = vld [vmem:[#allocation8 + $0x104] ss:$16 sps:$4 sm:$0xff]   ;;  %v4305_v7 = vld [vmem:[#allocation8 + $0x68] ss:$16 sps:$4 sm:$0xff]  }
  0x90   :  { %v4332_v45 = vld [vmem:[#allocation8 + $0x100] ss:$16 sps:$4 sm:$0xff]   ;;  %v4340_v46 = vld [vmem:[#allocation8 + $0x124] ss:$16 sps:$4 sm:$0xff]   ;;  %v4313_v8 = vld [vmem:[#allocation8 + $0x8c] ss:$16 sps:$4 sm:$0xff]  }
  0x91   :  { %4178 = vmatpush3.bf16.msra.mxu0 %v4256_v10  ;;  %v4338_v47 = vld [vmem:[#allocation8 + $0x120] ss:$16 sps:$4 sm:$0xff]   ;;  %v4346_v48 = vld [vmem:[#allocation8 + $0x144] ss:$16 sps:$4 sm:$0xff]   ;;  %v4311_v9 = vld [vmem:[#allocation8 + $0x88] ss:$16 sps:$4 sm:$0xff]  }
  0x92   :  { %4179 = vmatprep.subr.bf16.mxu0 %v4657_v0  ;;  %370 = vmatpush1.bf16.msra.mxu1 %v4274_v17  ;;  %v4344_v49 = vld [vmem:[#allocation8 + $0x140] ss:$16 sps:$4 sm:$0xff]   ;;  %v4352_v50 = vld [vmem:[#allocation8 + $0x164] ss:$16 sps:$4 sm:$0xff]   ;;  %v4319_v10 = vld [vmem:[#allocation8 + $0xac] ss:$16 sps:$4 sm:$0xff]  }
  0x93   :  { %371 = vmatprep.subr.bf16.mxu1 %v4275_v18  ;;  %v4350_v51 = vld [vmem:[#allocation8 + $0x160] ss:$16 sps:$4 sm:$0xff]   ;;  %v4358_v52 = vld [vmem:[#allocation8 + $0x184] ss:$16 sps:$4 sm:$0xff]   ;;  %v4317_v11 = vld [vmem:[#allocation8 + $0xa8] ss:$16 sps:$4 sm:$0xff]  }
  0x94   :  { %v4356_v53 = vld [vmem:[#allocation8 + $0x180] ss:$16 sps:$4 sm:$0xff]   ;;  %v4364_v54 = vld [vmem:[#allocation8 + $0x1a4] ss:$16 sps:$4 sm:$0xff]   ;;  %v4323_v13 = vld [vmem:[#allocation8 + $0xc8] ss:$16 sps:$4 sm:$0xff]  }
  0x95   :  { %4180 = vmatpush3.bf16.msra.mxu0 %v4257_v12  ;;  %v4362_v55 = vld [vmem:[#allocation8 + $0x1a0] ss:$16 sps:$4 sm:$0xff]   ;;  %v3644_v56 = vld [vmem:[%s4947_s2] ss:$0 sm:$0xff]  ;;  %v4325_v12 = vld [vmem:[#allocation8 + $0xcc] ss:$16 sps:$4 sm:$0xff]  }
  0x96   :  { %4181 = vmatprep.subr.bf16.mxu0 %v4657_v0  ;;  %372 = vmatpush1.bf16.msra.mxu1 %v4277_v20  ;;  %v4331_v14 = vld [vmem:[#allocation8 + $0xec] ss:$16 sps:$4 sm:$0xff]   ;;  %v4329_v15 = vld [vmem:[#allocation8 + $0xe8] ss:$16 sps:$4 sm:$0xff]  }
  0x97   :  { %373 = vmatprep.subr.bf16.mxu1 %v4278_v21  ;;  %v4335_v17 = vld [vmem:[#allocation8 + $0x108] ss:$16 sps:$4 sm:$0xff]   ;;  %v4343_v18 = vld [vmem:[#allocation8 + $0x12c] ss:$16 sps:$4 sm:$0xff]  }
  0x98   :  { %v4349_v20 = vld [vmem:[#allocation8 + $0x14c] ss:$16 sps:$4 sm:$0xff]   ;;  %v4347_v21 = vld [vmem:[#allocation8 + $0x148] ss:$16 sps:$4 sm:$0xff]  }
  0x99   :  { %4182 = vmatpush3.bf16.msra.mxu0 %v4258_v16  ;;  %v4337_v16 = vld [vmem:[#allocation8 + $0x10c] ss:$16 sps:$4 sm:$0xff]  }
  0x9a   :  { %4183 = vmatprep.subr.bf16.mxu0 %v4657_v0  ;;  %374 = vmatpush1.bf16.msra.mxu1 %v4280_v23  ;;  %v4353_v23 = vld [vmem:[#allocation8 + $0x168] ss:$16 sps:$4 sm:$0xff]   ;;  %v4367_v26 = vld [vmem:[#allocation8 + $0x1ac] ss:$16 sps:$4 sm:$0xff]  }
  0x9b   :  { %375 = vmatprep.subr.bf16.mxu1 %v4281_v24  ;;  %v4361_v24 = vld [vmem:[#allocation8 + $0x18c] ss:$16 sps:$4 sm:$0xff]  }
  0x9d   :  { %4184 = vmatpush3.bf16.msra.mxu0 %v4259_v19  ;;  %v4341_v19 = vld [vmem:[#allocation8 + $0x128] ss:$16 sps:$4 sm:$0xff]  }
  0x9e   :  { %376 = vmatpush1.bf16.msra.mxu1 %v4283_v25  ;;  %812 = vmatprep.subr.bf16.mxu0 %v4286_v28  ;;  %v4359_v25 = vld [vmem:[#allocation8 + $0x188] ss:$16 sps:$4 sm:$0xff]   ;;  %v4370_v28 = vld [vmem:[#allocation8 + $0x1c4] ss:$16 sps:$4 sm:$0xff]  }
  0x9f   :  { %853 = vmatprep.subr.bf16.mxu1 %v4289_v29  ;;  %v4373_v29 = vld [vmem:[#allocation8 + $0x1cc] ss:$16 sps:$4 sm:$0xff]  }
  0xa0   :  { %4186 = vmatmul.mubr.bf16.vlgmr.msra.gmra.mrb[0].mxu0 %v139_v22  ;;  %v4355_v22 = vld [vmem:[#allocation8 + $0x16c] ss:$16 sps:$4 sm:$0xff]  }
  0xa1   :  { %813 = vmatpush1.bf16.msra.mxu0 %v4284_v27  ;;  %v4365_v27 = vld [vmem:[#allocation8 + $0x1a8] ss:$16 sps:$4 sm:$0xff]  }
  0xa2   :  { %814 = vmatprep.subr.bf16.mxu0 %v4292_v30  ;;  %v4368_v30 = vld [vmem:[#allocation8 + $0x1c0] ss:$16 sps:$4 sm:$0xff]  }
  0xa5   :  { %815 = vmatpush1.bf16.msra.mxu0 %v4290_v31  ;;  %v4371_v31 = vld [vmem:[#allocation8 + $0x1c8] ss:$16 sps:$4 sm:$0xff]  }
  0xa6   :  { %816 = vmatprep.subr.bf16.mxu0 %v4298_v32  ;;  %v4376_v32 = vld [vmem:[#allocation8 + $0x1e4] ss:$16 sps:$4 sm:$0xff]  }
  0xa9   :  { %817 = vmatpush1.bf16.msra.mxu0 %v4296_v33  ;;  %v4379_v33 = vld [vmem:[#allocation8 + $0x1ec] ss:$16 sps:$4 sm:$0xff]  }
  0xaa   :  { %818 = vmatprep.subr.bf16.mxu0 %v4304_v34  ;;  %v4374_v34 = vld [vmem:[#allocation8 + $0x1e0] ss:$16 sps:$4 sm:$0xff]  }
  0xad   :  { %819 = vmatpush1.bf16.msra.mxu0 %v4302_v35  ;;  %v4377_v35 = vld [vmem:[#allocation8 + $0x1e8] ss:$16 sps:$4 sm:$0xff]  }
  0xae   :  { %820 = vmatprep.subr.bf16.mxu0 %v4310_v36  ;;  %v902_v36 = vld [vmem:[#allocation10] sm:$0xff] }
  0xb1   :  { %821 = vmatpush1.bf16.msra.mxu0 %v4308_v37  ;;  %v906_v37 = vld [vmem:[#allocation10 + $0x20] sm:$0xff] }
  0xb2   :  { %822 = vmatprep.subr.bf16.mxu0 %v4316_v38  ;;  %v903_v38 = vld [vmem:[#allocation10 + $0x8] sm:$0xff] }
  0xb5   :  { %823 = vmatpush1.bf16.msra.mxu0 %v4314_v39  ;;  %v3733_v39 = vcombine.low %v902_v36, %v906_v37 }
  0xb6   :  { %824 = vmatprep.subr.bf16.mxu0 %v4322_v40  ;;  %v3734_v40 = vcombine.high %v902_v36, %v906_v37  ;;  %v950_v36 = vld [vmem:[#allocation10 + $0x180] sm:$0xff] }
  0xb7   :  { %v954_v37 = vld [vmem:[#allocation10 + $0x1a0] sm:$0xff] }
  0xb9   :  { %825 = vmatpush1.bf16.msra.mxu0 %v4320_v41  ;;  %v907_v41 = vld [vmem:[#allocation10 + $0x28] sm:$0xff] }
  0xba   :  { %826 = vmatprep.subr.bf16.mxu0 %v4328_v42  ;;  %v3735_v42 = vcombine.low %v903_v38, %v907_v41 }
  0xbd   :  { %827 = vmatpush1.bf16.msra.mxu0 %v4326_v43  ;;  %v3736_v43 = vcombine.high %v903_v38, %v907_v41  ;;  %v951_v38 = vld [vmem:[#allocation10 + $0x188] sm:$0xff] }
  0xbe   :  { %828 = vmatprep.subr.bf16.mxu0 %v4334_v44  ;;  %v271_v44 = vlaneseq }
  0xc1   :  { %829 = vmatpush1.bf16.msra.mxu0 %v4332_v45  ;;  %v4837_v45 = vshrl.u32 %v271_v44, 7  ;;  %v958_v44 = vld [vmem:[#allocation10 + $0x1c0] sm:$0xff] }
  0xc2   :  { %830 = vmatprep.subr.bf16.mxu0 %v4340_v46 }
  0xc3   :  { %v4840_v46 = vsub.s32 0, %v4837_v45 }
  0xc5   :  { %831 = vmatpush1.bf16.msra.mxu0 %v4338_v47  ;;  %v269_v47 = vld [vmem:[%s4949_s4] sm:$0x3] }
  0xc6   :  { %832 = vmatprep.subr.bf16.mxu0 %v4346_v48  ;;  %v4846_v48 = vsub.s32 1, %v4837_v45 }
  0xc9   :  { %833 = vmatpush1.bf16.msra.mxu0 %v4344_v49  ;;  %v274_v49 = vrot.slane %v269_v47, %v4840_v46 }
  0xca   :  { %834 = vmatprep.subr.bf16.mxu0 %v4352_v50  ;;  %v278_v50 = vrot.slane %v269_v47, %v4846_v48  ;;  %v962_v47 = vld [vmem:[#allocation10 + $0x1e0] sm:$0xff] }
  0xcd   :  { %835 = vmatpush1.bf16.msra.mxu0 %v4350_v51 }
  0xce   :  { %836 = vmatprep.subr.bf16.mxu0 %v4358_v52 }
  0xd1   :  { %837 = vmatpush1.bf16.msra.mxu0 %v4356_v53 }
  0xd2   :  { %838 = vmatprep.subr.bf16.mxu0 %v4364_v54 }
  0xd5   :  { %839 = vmatpush1.bf16.msra.mxu0 %v4362_v55 }
  0xd6   :  { %840 = vmatprep.subr.bf16.mxu0 %v4370_v28  ;;  %v942_v28 = vld [vmem:[#allocation10 + $0x140] sm:$0xff] }
  0xd9   :  { %841 = vmatpush1.bf16.msra.mxu0 %v4368_v30  ;;  %v943_v30 = vld [vmem:[#allocation10 + $0x148] sm:$0xff] }
  0xda   :  { %842 = vmatprep.subr.bf16.mxu0 %v4376_v32 }
  0xdd   :  { %843 = vmatpush1.bf16.msra.mxu0 %v4374_v34 }
  0xde   :  { %2480 = vmatprep.subr.bf16.mxu0 %v3734_v40 }
 0x173   :  { %v245_v57 = vpop.f32.mrb[0].mxu0 }
 0x174   :  { %v246_v58 = vadd.f32 %v3644_v56, %v245_v57  ;;  %v4187_v59 = vpop.f32.mrb[1].mxu0 }
 0x175   :  { %v248_v60 = vpop.f32.mrb[2].mxu0 }
 0x176   :  { %v251_v61 = vmax.f32 %v246_v58, 0.0  ;;  %v4188_v62 = vpop.f32.mrb[3].mxu0  ;;  %v910_v58 = vld [vmem:[#allocation10 + $0x40] sm:$0xff] }
 0x177   :  { %v914_v60 = vld [vmem:[#allocation10 + $0x60] sm:$0xff]  ;;  %v915_v62 = vld [vmem:[#allocation10 + $0x68] sm:$0xff] }
 0x178   :  { %v252_v1 = vpack.c.bf16 %v251_v61, %v251_v61  ;;  %v911_v61 = vld [vmem:[#allocation10 + $0x48] sm:$0xff] }
 0x17a   :  { %394 = vmatmul.mubr.bf16.vlgmr.msra.gmra.mrb[0].mxu1 %v252_v1 }
 0x17b   :  { %854 = vmatpush1.bf16.msra.mxu1 %v4287_v63 }
 0x17c   :  { %855 = vmatprep.subr.bf16.mxu1 %v4295_v2  ;;  %v3742_v2 = vcombine.high %v910_v58, %v914_v60 }
 0x17f   :  { %856 = vmatpush1.bf16.msra.mxu1 %v4293_v3  ;;  %v3744_v3 = vcombine.high %v911_v61, %v915_v62 }
 0x180   :  { %857 = vmatprep.subr.bf16.mxu1 %v4301_v4  ;;  %v918_v4 = vld [vmem:[#allocation10 + $0x80] sm:$0xff] }
 0x183   :  { %858 = vmatpush1.bf16.msra.mxu1 %v4299_v5  ;;  %v922_v5 = vld [vmem:[#allocation10 + $0xa0] sm:$0xff] }
 0x184   :  { %859 = vmatprep.subr.bf16.mxu1 %v4307_v6  ;;  %v919_v6 = vld [vmem:[#allocation10 + $0x88] sm:$0xff] }
 0x187   :  { %860 = vmatpush1.bf16.msra.mxu1 %v4305_v7  ;;  %v923_v7 = vld [vmem:[#allocation10 + $0xa8] sm:$0xff] }
 0x188   :  { %861 = vmatprep.subr.bf16.mxu1 %v4313_v8  ;;  %v3741_v8 = vcombine.low %v910_v58, %v914_v60  ;;  %v971_v58 = vld [vmem:[#allocation10 + $0x228] sm:$0xff] }
 0x18b   :  { %862 = vmatpush1.bf16.msra.mxu1 %v4311_v9  ;;  %v3743_v9 = vcombine.low %v911_v61, %v915_v62 }
 0x18c   :  { %863 = vmatprep.subr.bf16.mxu1 %v4319_v10  ;;  %v3750_v10 = vcombine.high %v918_v4, %v922_v5 }
 0x18f   :  { %864 = vmatpush1.bf16.msra.mxu1 %v4317_v11  ;;  %v3752_v11 = vcombine.high %v919_v6, %v923_v7 }
 0x190   :  { %865 = vmatprep.subr.bf16.mxu1 %v4325_v12  ;;  %v926_v12 = vld [vmem:[#allocation10 + $0xc0] sm:$0xff] }
 0x193   :  { %866 = vmatpush1.bf16.msra.mxu1 %v4323_v13  ;;  %v930_v13 = vld [vmem:[#allocation10 + $0xe0] sm:$0xff] }
 0x194   :  { %867 = vmatprep.subr.bf16.mxu1 %v4331_v14  ;;  %v927_v14 = vld [vmem:[#allocation10 + $0xc8] sm:$0xff] }
 0x197   :  { %868 = vmatpush1.bf16.msra.mxu1 %v4329_v15  ;;  %v931_v15 = vld [vmem:[#allocation10 + $0xe8] sm:$0xff] }
 0x198   :  { %869 = vmatprep.subr.bf16.mxu1 %v4337_v16  ;;  %v3749_v16 = vcombine.low %v918_v4, %v922_v5 }
 0x19b   :  { %870 = vmatpush1.bf16.msra.mxu1 %v4335_v17  ;;  %v3751_v17 = vcombine.low %v919_v6, %v923_v7 }
 0x19c   :  { %871 = vmatprep.subr.bf16.mxu1 %v4343_v18  ;;  %v3758_v18 = vcombine.high %v926_v12, %v930_v13 }
 0x19f   :  { %872 = vmatpush1.bf16.msra.mxu1 %v4341_v19  ;;  %v3760_v19 = vcombine.high %v927_v14, %v931_v15 }
 0x1a0   :  { %873 = vmatprep.subr.bf16.mxu1 %v4349_v20  ;;  %v934_v20 = vld [vmem:[#allocation10 + $0x100] sm:$0xff] }
 0x1a3   :  { %874 = vmatpush1.bf16.msra.mxu1 %v4347_v21  ;;  %v938_v21 = vld [vmem:[#allocation10 + $0x120] sm:$0xff] }
 0x1a4   :  { %875 = vmatprep.subr.bf16.mxu1 %v4355_v22  ;;  %v935_v22 = vld [vmem:[#allocation10 + $0x108] sm:$0xff]  ;;  %v3765_v32 = vcombine.low %v934_v20, %v938_v21 }
 0x1a7   :  { %876 = vmatpush1.bf16.msra.mxu1 %v4353_v23  ;;  %v939_v23 = vld [vmem:[#allocation10 + $0x128] sm:$0xff] }
 0x1a8   :  { %877 = vmatprep.subr.bf16.mxu1 %v4361_v24  ;;  %v3757_v24 = vcombine.low %v926_v12, %v930_v13 }
 0x1ab   :  { %878 = vmatpush1.bf16.msra.mxu1 %v4359_v25  ;;  %v3759_v25 = vcombine.low %v927_v14, %v931_v15 }
 0x1ac   :  { %879 = vmatprep.subr.bf16.mxu1 %v4367_v26  ;;  %v3766_v26 = vcombine.high %v934_v20, %v938_v21 }
 0x1af   :  { %880 = vmatpush1.bf16.msra.mxu1 %v4365_v27  ;;  %v3768_v27 = vcombine.high %v935_v22, %v939_v23 }
 0x1b0   :  { %881 = vmatprep.subr.bf16.mxu1 %v4373_v29  ;;  %v946_v29 = vld [vmem:[#allocation10 + $0x160] sm:$0xff] }
 0x1b1   :  { %v3774_v34 = vcombine.high %v942_v28, %v946_v29  ;;  %v3773_v40 = vcombine.low %v942_v28, %v946_v29 }
 0x1b3   :  { %882 = vmatpush1.bf16.msra.mxu1 %v4371_v31  ;;  %v947_v31 = vld [vmem:[#allocation10 + $0x168] sm:$0xff] }
 0x1b4   :  { %883 = vmatprep.subr.bf16.mxu1 %v4379_v33  ;;  %v3767_v33 = vcombine.low %v935_v22, %v939_v23  ;;  %v3775_v41 = vcombine.low %v943_v30, %v947_v31 }
 0x1b7   :  { %884 = vmatpush1.bf16.msra.mxu1 %v4377_v35  ;;  %v3776_v35 = vcombine.high %v943_v30, %v947_v31 }
 0x1b8   :  { %2562 = vmatprep.subr.bf16.mxu1 %v3736_v43 }
 0x24d   :  { %v395_v51 = vpop.f32.mrb[0].mxu1 }
 0x24e   :  { %v396_v52 = vadd.f32 %v395_v51, %v274_v49  ;;  %v397_v53 = vpop.f32.mrb[1].mxu1  ;;  %v959_v49 = vld [vmem:[#allocation10 + $0x1c8] sm:$0xff]  ;;  %v3781_v51 = vcombine.low %v950_v36, %v954_v37 }
 0x24f   :  { %v398_v54 = vadd.f32 %v397_v53, %v278_v50  ;;  %v399_v55 = vpop.f32.mrb[2].mxu1  ;;  %v963_v50 = vld [vmem:[#allocation10 + $0x1e8] sm:$0xff]  ;;  %v3790_v53 = vcombine.high %v958_v44, %v962_v47 }
 0x250   :  { %v402_v56 = vmax.f32 %v396_v52, 0.0  ;;  %v400_v57 = vpop.f32.mrb[3].mxu1  ;;  %v966_v55 = vld [vmem:[#allocation10 + $0x200] sm:$0xff]  ;;  %v3791_v60 = vcombine.low %v959_v49, %v963_v50 }
 0x251   :  { %v403_v59 = vmax.f32 %v398_v54, 0.0  ;;  %v3792_v54 = vcombine.high %v959_v49, %v963_v50  ;;  %v967_v57 = vld [vmem:[#allocation10 + $0x208] sm:$0xff] }
 0x252   :  { %v404_v1 = vpack.c.bf16 %v402_v56, %v402_v56  ;;  %v970_v56 = vld [vmem:[#allocation10 + $0x220] sm:$0xff]  ;;  %v3800_v62 = vcombine.high %v967_v57, %v971_v58  ;;  %v3799_v5 = vcombine.low %v967_v57, %v971_v58  ;;  %v1019_v49 = vld [vmem:[#allocation10 + $0x3a8] sm:$0xff] }
 0x253   :  { %v405_v63 = vpack.c.bf16 %v403_v59, %v403_v59  ;;  %v3789_v59 = vcombine.low %v958_v44, %v962_v47  ;;  %v3798_v61 = vcombine.high %v966_v55, %v970_v56  ;;  %v3797_v4 = vcombine.low %v966_v55, %v970_v56  ;;  %v1015_v44 = vld [vmem:[#allocation10 + $0x388] sm:$0xff] }
 0x254   :  { %v1023_v55 = vld [vmem:[#allocation10 + $0x3c8] sm:$0xff] }
 0x255   :  { %844 = vmatprep.mubr.bf16.mxu0 %v405_v63  ;;  %885 = vmatprep.mubr.bf16.mxu1 %v405_v63  ;;  %v974_v63 = vld [vmem:[#allocation10 + $0x240] sm:$0xff]  ;;  %v1027_v57 = vld [vmem:[#allocation10 + $0x3e8] sm:$0xff] }
 0x256   :  { %845 = vmatmul.mubr.bf16.vlgmr.msra.gmra.mrb[4].mxu0 %v404_v1  ;;  %886 = vmatmul.mubr.bf16.vlgmr.msra.gmra.mrb[4].mxu1 %v404_v1  ;;  %v978_v1 = vld [vmem:[#allocation10 + $0x260] sm:$0xff] }
 0x257   :  { %2481 = vmatpush1.bf16.msra.mxu0 %v3733_v39  ;;  %2563 = vmatpush1.bf16.msra.mxu1 %v3735_v42  ;;  %v955_v39 = vld [vmem:[#allocation10 + $0x1a8] sm:$0xff]  ;;  %v3782_v42 = vcombine.high %v950_v36, %v954_v37  ;;  %v3806_v6 = vcombine.high %v974_v63, %v978_v1  ;;  %v3805_v12 = vcombine.low %v974_v63, %v978_v1 }
 0x258   :  { %2482 = vmatprep.subr.bf16.mxu0 %v3742_v2  ;;  %2564 = vmatprep.subr.bf16.mxu1 %v3744_v3  ;;  %v3784_v43 = vcombine.high %v951_v38, %v955_v39  ;;  %v3783_v52 = vcombine.low %v951_v38, %v955_v39  ;;  %v975_v2 = vld [vmem:[#allocation10 + $0x248] sm:$0xff] }
 0x259   :  { %v979_v3 = vld [vmem:[#allocation10 + $0x268] sm:$0xff] }
 0x25a   :  { %v3808_v7 = vcombine.high %v975_v2, %v979_v3  ;;  %v3807_v13 = vcombine.low %v975_v2, %v979_v3  ;;  %v1031_v63 = vld [vmem:[#allocation10 + $0x408] sm:$0xff] }
 0x25b   :  { %2483 = vmatpush1.bf16.msra.mxu0 %v3741_v8  ;;  %2565 = vmatpush1.bf16.msra.mxu1 %v3743_v9  ;;  %v982_v8 = vld [vmem:[#allocation10 + $0x280] sm:$0xff]  ;;  %v1035_v2 = vld [vmem:[#allocation10 + $0x428] sm:$0xff] }
 0x25c   :  { %2484 = vmatprep.subr.bf16.mxu0 %v3750_v10  ;;  %2566 = vmatprep.subr.bf16.mxu1 %v3752_v11  ;;  %v986_v9 = vld [vmem:[#allocation10 + $0x2a0] sm:$0xff]  ;;  %v983_v10 = vld [vmem:[#allocation10 + $0x288] sm:$0xff] }
 0x25d   :  { %v987_v11 = vld [vmem:[#allocation10 + $0x2a8] sm:$0xff]  ;;  %v3814_v14 = vcombine.high %v982_v8, %v986_v9  ;;  %v3813_v20 = vcombine.low %v982_v8, %v986_v9 }
 0x25e   :  { %v3816_v15 = vcombine.high %v983_v10, %v987_v11  ;;  %v3815_v21 = vcombine.low %v983_v10, %v987_v11 }
 0x25f   :  { %2485 = vmatpush1.bf16.msra.mxu0 %v3749_v16  ;;  %2567 = vmatpush1.bf16.msra.mxu1 %v3751_v17  ;;  %v990_v16 = vld [vmem:[#allocation10 + $0x2c0] sm:$0xff] }
 0x260   :  { %2486 = vmatprep.subr.bf16.mxu0 %v3758_v18  ;;  %2568 = vmatprep.subr.bf16.mxu1 %v3760_v19  ;;  %v994_v17 = vld [vmem:[#allocation10 + $0x2e0] sm:$0xff]  ;;  %v991_v18 = vld [vmem:[#allocation10 + $0x2c8] sm:$0xff] }
 0x261   :  { %v995_v19 = vld [vmem:[#allocation10 + $0x2e8] sm:$0xff]  ;;  %v3822_v22 = vcombine.high %v990_v16, %v994_v17  ;;  %v3821_v28 = vcombine.low %v990_v16, %v994_v17 }
 0x262   :  { %v3824_v23 = vcombine.high %v991_v18, %v995_v19  ;;  %v3823_v29 = vcombine.low %v991_v18, %v995_v19 }
 0x263   :  { %2487 = vmatpush1.bf16.msra.mxu0 %v3757_v24  ;;  %2569 = vmatpush1.bf16.msra.mxu1 %v3759_v25  ;;  %v998_v24 = vld [vmem:[#allocation10 + $0x300] sm:$0xff] }
 0x264   :  { %2488 = vmatprep.subr.bf16.mxu0 %v3766_v26  ;;  %2570 = vmatprep.subr.bf16.mxu1 %v3768_v27  ;;  %v1002_v25 = vld [vmem:[#allocation10 + $0x320] sm:$0xff]  ;;  %v999_v26 = vld [vmem:[#allocation10 + $0x308] sm:$0xff] }
 0x265   :  { %v1003_v27 = vld [vmem:[#allocation10 + $0x328] sm:$0xff]  ;;  %v3830_v30 = vcombine.high %v998_v24, %v1002_v25  ;;  %v3829_v36 = vcombine.low %v998_v24, %v1002_v25  ;;  %v1038_v24 = vld [vmem:[#allocation10 + $0x440] sm:$0xff] }
 0x266   :  { %v3832_v31 = vcombine.high %v999_v26, %v1003_v27  ;;  %v3831_v37 = vcombine.low %v999_v26, %v1003_v27  ;;  %v1042_v26 = vld [vmem:[#allocation10 + $0x460] sm:$0xff]  ;;  %v1039_v27 = vld [vmem:[#allocation10 + $0x448] sm:$0xff] }
 0x267   :  { %2489 = vmatpush1.bf16.msra.mxu0 %v3765_v32  ;;  %2571 = vmatpush1.bf16.msra.mxu1 %v3767_v33  ;;  %v1006_v32 = vld [vmem:[#allocation10 + $0x340] sm:$0xff] }
 0x268   :  { %2490 = vmatprep.subr.bf16.mxu0 %v3774_v34  ;;  %2572 = vmatprep.subr.bf16.mxu1 %v3776_v35  ;;  %v1010_v33 = vld [vmem:[#allocation10 + $0x360] sm:$0xff]  ;;  %v1007_v34 = vld [vmem:[#allocation10 + $0x348] sm:$0xff] }
 0x269   :  { %v1011_v35 = vld [vmem:[#allocation10 + $0x368] sm:$0xff]  ;;  %v3838_v38 = vcombine.high %v1006_v32, %v1010_v33 }
 0x26a   :  { %v3840_v39 = vcombine.high %v1007_v34, %v1011_v35 }
 0x26b   :  { %2491 = vmatpush1.bf16.msra.mxu0 %v3773_v40  ;;  %2573 = vmatpush1.bf16.msra.mxu1 %v3775_v41  ;;  %v3837_v40 = vcombine.low %v1006_v32, %v1010_v33  ;;  %v3839_v41 = vcombine.low %v1007_v34, %v1011_v35  ;;  %v3870_v32 = vcombine.high %v1038_v24, %v1042_v26  ;;  %v1050_v34 = vld [vmem:[#allocation10 + $0x4a0] sm:$0xff]  ;;  %v1047_v35 = vld [vmem:[#allocation10 + $0x488] sm:$0xff] }
 0x26c   :  { %2492 = vmatprep.subr.bf16.mxu0 %v3782_v42  ;;  %2574 = vmatprep.subr.bf16.mxu1 %v3784_v43  ;;  %v1014_v42 = vld [vmem:[#allocation10 + $0x380] sm:$0xff] }
 0x26d   :  { %v1018_v43 = vld [vmem:[#allocation10 + $0x3a0] sm:$0xff] }
 0x26e   :  { %v3846_v47 = vcombine.high %v1014_v42, %v1018_v43  ;;  %v3845_v50 = vcombine.low %v1014_v42, %v1018_v43  ;;  %v1054_v42 = vld [vmem:[#allocation10 + $0x4c0] sm:$0xff] }
 0x26f   :  { %2493 = vmatpush1.bf16.msra.mxu0 %v3781_v51  ;;  %2575 = vmatpush1.bf16.msra.mxu1 %v3783_v52  ;;  %v3847_v51 = vcombine.low %v1015_v44, %v1019_v49  ;;  %v3848_v52 = vcombine.high %v1015_v44, %v1019_v49  ;;  %v1058_v43 = vld [vmem:[#allocation10 + $0x4e0] sm:$0xff]  ;;  %v1055_v44 = vld [vmem:[#allocation10 + $0x4c8] sm:$0xff] }
 0x270   :  { %2494 = vmatprep.subr.bf16.mxu0 %v3790_v53  ;;  %2576 = vmatprep.subr.bf16.mxu1 %v3792_v54  ;;  %v1022_v53 = vld [vmem:[#allocation10 + $0x3c0] sm:$0xff] }
 0x271   :  { %v1026_v54 = vld [vmem:[#allocation10 + $0x3e0] sm:$0xff] }
 0x272   :  { %v3854_v56 = vcombine.high %v1022_v53, %v1026_v54  ;;  %v3853_v58 = vcombine.low %v1022_v53, %v1026_v54  ;;  %v1062_v53 = vld [vmem:[#allocation10 + $0x500] sm:$0xff] }
 0x273   :  { %2495 = vmatpush1.bf16.msra.mxu0 %v3789_v59  ;;  %2577 = vmatpush1.bf16.msra.mxu1 %v3791_v60  ;;  %v3855_v59 = vcombine.low %v1023_v55, %v1027_v57  ;;  %v3856_v60 = vcombine.high %v1023_v55, %v1027_v57  ;;  %v1066_v54 = vld [vmem:[#allocation10 + $0x520] sm:$0xff]  ;;  %v1063_v55 = vld [vmem:[#allocation10 + $0x508] sm:$0xff]  ;;  %v3885_v57 = vcombine.low %v1054_v42, %v1058_v43 }
 0x274   :  { %2496 = vmatprep.subr.bf16.mxu0 %v3798_v61  ;;  %2578 = vmatprep.subr.bf16.mxu1 %v3800_v62  ;;  %v1030_v61 = vld [vmem:[#allocation10 + $0x400] sm:$0xff] }
 0x275   :  { %v1034_v62 = vld [vmem:[#allocation10 + $0x420] sm:$0xff] }
 0x276   :  { %v3862_v1 = vcombine.high %v1030_v61, %v1034_v62  ;;  %v3861_v3 = vcombine.low %v1030_v61, %v1034_v62  ;;  %v1070_v61 = vld [vmem:[#allocation10 + $0x540] sm:$0xff] }
 0x277   :  { %2497 = vmatpush1.bf16.msra.mxu0 %v3797_v4  ;;  %2579 = vmatpush1.bf16.msra.mxu1 %v3799_v5  ;;  %v3863_v4 = vcombine.low %v1031_v63, %v1035_v2  ;;  %v3864_v5 = vcombine.high %v1031_v63, %v1035_v2  ;;  %v1074_v62 = vld [vmem:[#allocation10 + $0x560] sm:$0xff]  ;;  %v1071_v63 = vld [vmem:[#allocation10 + $0x548] sm:$0xff]  ;;  %v3893_v2 = vcombine.low %v1062_v53, %v1066_v54 }
 0x278   :  { %2498 = vmatprep.subr.bf16.mxu0 %v3806_v6  ;;  %2580 = vmatprep.subr.bf16.mxu1 %v3808_v7  ;;  %v4853_v6 = vld [vmem:[%s4951_s6] sm:$0xf]  ;;  %v486_v7 = vsub.s32 3, %v4837_v45 }
 0x279   :  { %v475_v8 = vrot.slane %v4853_v6, %v4840_v46  ;;  %v479_v9 = vrot.slane %v4853_v6, %v4846_v48 }
 0x27a   :  { %v487_v10 = vrot.slane %v4853_v6, %v486_v7 }
 0x27b   :  { %2499 = vmatpush1.bf16.msra.mxu0 %v3805_v12  ;;  %2581 = vmatpush1.bf16.msra.mxu1 %v3807_v13 }
 0x27c   :  { %2500 = vmatprep.subr.bf16.mxu0 %v3814_v14  ;;  %2582 = vmatprep.subr.bf16.mxu1 %v3816_v15 }
 0x27f   :  { %2501 = vmatpush1.bf16.msra.mxu0 %v3813_v20  ;;  %2583 = vmatpush1.bf16.msra.mxu1 %v3815_v21 }
 0x280   :  { %2502 = vmatprep.subr.bf16.mxu0 %v3822_v22  ;;  %2584 = vmatprep.subr.bf16.mxu1 %v3824_v23 }
 0x283   :  { %2503 = vmatpush1.bf16.msra.mxu0 %v3821_v28  ;;  %2585 = vmatpush1.bf16.msra.mxu1 %v3823_v29  ;;  %v1043_v28 = vld [vmem:[#allocation10 + $0x468] sm:$0xff] }
 0x284   :  { %2504 = vmatprep.subr.bf16.mxu0 %v3830_v30  ;;  %2586 = vmatprep.subr.bf16.mxu1 %v3832_v31  ;;  %v1046_v31 = vld [vmem:[#allocation10 + $0x480] sm:$0xff]  ;;  %v3872_v33 = vcombine.high %v1039_v27, %v1043_v28 }
 0x285   :  { %v3877_v49 = vcombine.low %v1046_v31, %v1050_v34 }
 0x287   :  { %2505 = vmatpush1.bf16.msra.mxu0 %v3829_v36  ;;  %2587 = vmatpush1.bf16.msra.mxu1 %v3831_v37  ;;  %v1051_v36 = vld [vmem:[#allocation10 + $0x4a8] sm:$0xff] }
 0x288   :  { %2506 = vmatprep.subr.bf16.mxu0 %v3838_v38  ;;  %2588 = vmatprep.subr.bf16.mxu1 %v3840_v39  ;;  %v3869_v38 = vcombine.low %v1038_v24, %v1042_v26  ;;  %v3871_v39 = vcombine.low %v1039_v27, %v1043_v28  ;;  %v1098_v26 = vld [vmem:[#allocation10 + $0x620] sm:$0xff]  ;;  %v1095_v27 = vld [vmem:[#allocation10 + $0x608] sm:$0xff] }
 0x289   :  { %v1099_v28 = vld [vmem:[#allocation10 + $0x628] sm:$0xff] }
 0x28b   :  { %2507 = vmatpush1.bf16.msra.mxu0 %v3837_v40  ;;  %2589 = vmatpush1.bf16.msra.mxu1 %v3839_v41  ;;  %v3878_v40 = vcombine.high %v1046_v31, %v1050_v34  ;;  %v3880_v41 = vcombine.high %v1047_v35, %v1051_v36  ;;  %v3928_v34 = vcombine.high %v1095_v27, %v1099_v28 }
 0x28c   :  { %2508 = vmatprep.subr.bf16.mxu0 %v3846_v47  ;;  %2590 = vmatprep.subr.bf16.mxu1 %v3848_v52  ;;  %v1059_v47 = vld [vmem:[#allocation10 + $0x4e8] sm:$0xff] }
 0x28d   :  { %v3888_v52 = vcombine.high %v1055_v44, %v1059_v47 }
 0x28f   :  { %2509 = vmatpush1.bf16.msra.mxu0 %v3845_v50  ;;  %2591 = vmatpush1.bf16.msra.mxu1 %v3847_v51  ;;  %v3879_v50 = vcombine.low %v1047_v35, %v1051_v36  ;;  %v3886_v51 = vcombine.high %v1054_v42, %v1058_v43  ;;  %v1102_v35 = vld [vmem:[#allocation10 + $0x640] sm:$0xff] }
 0x290   :  { %2510 = vmatprep.subr.bf16.mxu0 %v3854_v56  ;;  %2592 = vmatprep.subr.bf16.mxu1 %v3856_v60  ;;  %v1067_v56 = vld [vmem:[#allocation10 + $0x528] sm:$0xff]  ;;  %v1106_v36 = vld [vmem:[#allocation10 + $0x660] sm:$0xff] }
 0x291   :  { %v3896_v60 = vcombine.high %v1063_v55, %v1067_v56  ;;  %v3934_v42 = vcombine.high %v1102_v35, %v1106_v36 }
 0x293   :  { %2511 = vmatpush1.bf16.msra.mxu0 %v3853_v58  ;;  %2593 = vmatpush1.bf16.msra.mxu1 %v3855_v59  ;;  %v3887_v58 = vcombine.low %v1055_v44, %v1059_v47  ;;  %v3894_v59 = vcombine.high %v1062_v53, %v1066_v54  ;;  %v1110_v44 = vld [vmem:[#allocation10 + $0x680] sm:$0xff] }
 0x294   :  { %2521 = vmatprep.subr.bf16.mxu0 %v3862_v1  ;;  %2603 = vmatprep.subr.bf16.mxu1 %v3864_v5  ;;  %v1075_v1 = vld [vmem:[#allocation10 + $0x568] sm:$0xff]  ;;  %v1114_v47 = vld [vmem:[#allocation10 + $0x6a0] sm:$0xff] }
 0x295   :  { %v3904_v5 = vcombine.high %v1071_v63, %v1075_v1  ;;  %v3942_v53 = vcombine.high %v1110_v44, %v1114_v47 }
 0x329   :  { %v846_v11 = vpop.f32.mrb[4].mxu0  ;;  %v4863_v12 = vpop.f32.mrb[4].mxu1 }
 0x32a   :  { %v847_v13 = vadd.f32 %v846_v11, %v475_v8  ;;  %v848_v14 = vpop.f32.mrb[5].mxu0  ;;  %v889_v15 = vpop.f32.mrb[5].mxu1  ;;  %v1078_v8 = vld [vmem:[#allocation10 + $0x580] sm:$0xff]  ;;  %v1083_v11 = vld [vmem:[#allocation10 + $0x5a8] sm:$0xff] }
 0x32b   :  { %v849_v16 = vadd.f32 %v848_v14, %v479_v9  ;;  %v890_v17 = vadd.f32 %v889_v15, %v487_v10  ;;  %v850_v18 = vpop.f32.mrb[6].mxu0  ;;  %v891_v19 = vpop.f32.mrb[6].mxu1  ;;  %v1082_v9 = vld [vmem:[#allocation10 + $0x5a0] sm:$0xff]  ;;  %v1079_v10 = vld [vmem:[#allocation10 + $0x588] sm:$0xff]  ;;  %v3903_v14 = vcombine.low %v1071_v63, %v1075_v1 }
 0x32c   :  { %v894_v20 = vmax.f32 %v847_v13, 0.0  ;;  %v851_v21 = vpop.f32.mrb[7].mxu0  ;;  %v892_v22 = vpop.f32.mrb[7].mxu1  ;;  %v3901_v13 = vcombine.low %v1070_v61, %v1074_v62  ;;  %v3910_v15 = vcombine.high %v1078_v8, %v1082_v9  ;;  %v1090_v18 = vld [vmem:[#allocation10 + $0x5e0] sm:$0xff]  ;;  %v1087_v19 = vld [vmem:[#allocation10 + $0x5c8] sm:$0xff] }
 0x32d   :  { %v895_v23 = vmax.f32 %v849_v16, 0.0  ;;  %v897_v25 = vmax.f32 %v890_v17, 0.0  ;;  %v3912_v16 = vcombine.high %v1079_v10, %v1083_v11  ;;  %v1086_v17 = vld [vmem:[#allocation10 + $0x5c0] sm:$0xff]  ;;  %v3909_v21 = vcombine.low %v1078_v8, %v1082_v9 }
 0x32e   :  { %v4867_v30 = vpack.c.bf16 %v894_v20, %v894_v20  ;;  %v1091_v20 = vld [vmem:[#allocation10 + $0x5e8] sm:$0xff]  ;;  %v3911_v22 = vcombine.low %v1079_v10, %v1083_v11  ;;  %v3917_v31 = vcombine.low %v1086_v17, %v1090_v18  ;;  %v1126_v63 = vld [vmem:[#allocation10 + $0x700] sm:$0xff] }
 0x32f   :  { %v4865_v29 = vpack.c.bf16 %v895_v23, %v895_v23  ;;  %v4871_v37 = vpack.c.bf16 %v897_v25, %v897_v25  ;;  %v3918_v23 = vcombine.high %v1086_v17, %v1090_v18  ;;  %v3920_v24 = vcombine.high %v1087_v19, %v1091_v20  ;;  %v1094_v25 = vld [vmem:[#allocation10 + $0x600] sm:$0xff] }
 0x330   :  { %v1130_v1 = vld [vmem:[#allocation10 + $0x720] sm:$0xff]  ;;  %v482_v17 = vsub.s32 2, %v4837_v45 }
 0x331   :  { %2512 = vmatprep.mubr.bf16.mxu0 %v4865_v29  ;;  %2594 = vmatprep.mubr.bf16.mxu1 %v4865_v29  ;;  %v3958_v8 = vcombine.high %v1126_v63, %v1130_v1  ;;  %v1134_v10 = vld [vmem:[#allocation10 + $0x740] sm:$0xff] }
 0x332   :  { %2513 = vmatmul.mubr.bf16.vlgmr.msra.gmra.mrb[8].mxu0 %v4867_v30  ;;  %2595 = vmatmul.mubr.bf16.vlgmr.msra.gmra.mrb[8].mxu1 %v4867_v30  ;;  %v1138_v11 = vld [vmem:[#allocation10 + $0x760] sm:$0xff] }
 0x333   :  { %2522 = vmatpush1.bf16.msra.mxu0 %v3861_v3  ;;  %2604 = vmatpush1.bf16.msra.mxu1 %v3863_v4  ;;  %v3895_v3 = vcombine.low %v1063_v55, %v1067_v56  ;;  %v3902_v4 = vcombine.high %v1070_v61, %v1074_v62  ;;  %v1118_v55 = vld [vmem:[#allocation10 + $0x6c0] sm:$0xff]  ;;  %v3966_v18 = vcombine.high %v1134_v10, %v1138_v11 }
 0x334   :  { %2553 = vmatprep.mubr.bf16.mxu0 %v4871_v37  ;;  %2635 = vmatprep.mubr.bf16.mxu1 %v4871_v37  ;;  %v1122_v56 = vld [vmem:[#allocation10 + $0x6e0] sm:$0xff] }
 0x335   :  { %2523 = vmatprep.subr.bf16.mxu0 %v3870_v32  ;;  %2605 = vmatprep.subr.bf16.mxu1 %v3872_v33  ;;  %v3919_v32 = vcombine.low %v1087_v19, %v1091_v20  ;;  %v3926_v33 = vcombine.high %v1094_v25, %v1098_v26  ;;  %v3950_v61 = vcombine.high %v1118_v55, %v1122_v56  ;;  %v1142_v20 = vld [vmem:[#allocation10 + $0x780] sm:$0xff] }
 0x337   :  { %2524 = vmatpush1.bf16.msra.mxu0 %v3869_v38  ;;  %2606 = vmatpush1.bf16.msra.mxu1 %v3871_v39  ;;  %v1103_v38 = vld [vmem:[#allocation10 + $0x648] sm:$0xff] }
 0x338   :  { %2525 = vmatprep.subr.bf16.mxu0 %v3878_v40  ;;  %2607 = vmatprep.subr.bf16.mxu1 %v3880_v41  ;;  %v1107_v39 = vld [vmem:[#allocation10 + $0x668] sm:$0xff]  ;;  %v3925_v40 = vcombine.low %v1094_v25, %v1098_v26  ;;  %v3927_v41 = vcombine.low %v1095_v27, %v1099_v28  ;;  %v483_v26 = vrot.slane %v4853_v6, %v482_v17  ;;  %v908_v6 = vld [vmem:[#allocation10 + $0x30] sm:$0xff] }
 0x339   :  { %v3936_v43 = vcombine.high %v1103_v38, %v1107_v39 }
 0x33b   :  { %2526 = vmatpush1.bf16.msra.mxu0 %v3877_v49  ;;  %2608 = vmatpush1.bf16.msra.mxu1 %v3879_v50  ;;  %v1111_v49 = vld [vmem:[#allocation10 + $0x688] sm:$0xff] }
 0x33c   :  { %2527 = vmatprep.subr.bf16.mxu0 %v3886_v51  ;;  %2609 = vmatprep.subr.bf16.mxu1 %v3888_v52  ;;  %v1115_v50 = vld [vmem:[#allocation10 + $0x6a8] sm:$0xff]  ;;  %v3933_v51 = vcombine.low %v1102_v35, %v1106_v36  ;;  %v3935_v52 = vcombine.low %v1103_v38, %v1107_v39  ;;  %v888_v38 = vadd.f32 %v4863_v12, %v483_v26  ;;  %v913_v12 = vld [vmem:[#allocation10 + $0x58] sm:$0xff] }
 0x33d   :  { %v3944_v54 = vcombine.high %v1111_v49, %v1115_v50  ;;  %v945_v26 = vld [vmem:[#allocation10 + $0x158] sm:$0xff] }
 0x33f   :  { %2528 = vmatpush1.bf16.msra.mxu0 %v3885_v57  ;;  %2610 = vmatpush1.bf16.msra.mxu1 %v3887_v58  ;;  %v1119_v57 = vld [vmem:[#allocation10 + $0x6c8] sm:$0xff] }
 0x340   :  { %2529 = vmatprep.subr.bf16.mxu0 %v3894_v59  ;;  %2611 = vmatprep.subr.bf16.mxu1 %v3896_v60  ;;  %v1123_v58 = vld [vmem:[#allocation10 + $0x6e8] sm:$0xff]  ;;  %v3941_v59 = vcombine.low %v1110_v44, %v1114_v47  ;;  %v3943_v60 = vcombine.low %v1111_v49, %v1115_v50  ;;  %v896_v49 = vmax.f32 %v888_v38, 0.0  ;;  %v957_v38 = vld [vmem:[#allocation10 + $0x1b8] sm:$0xff] }
 0x341   :  { %v3952_v62 = vcombine.high %v1119_v57, %v1123_v58 }
 0x343   :  { %2530 = vmatpush1.bf16.msra.mxu0 %v3893_v2  ;;  %2612 = vmatpush1.bf16.msra.mxu1 %v3895_v3  ;;  %v1127_v2 = vld [vmem:[#allocation10 + $0x708] sm:$0xff] }
 0x344   :  { %2531 = vmatprep.subr.bf16.mxu0 %v3902_v4  ;;  %2613 = vmatprep.subr.bf16.mxu1 %v3904_v5  ;;  %v1131_v3 = vld [vmem:[#allocation10 + $0x728] sm:$0xff]  ;;  %v3949_v4 = vcombine.low %v1118_v55, %v1122_v56  ;;  %v3951_v5 = vcombine.low %v1119_v57, %v1123_v58  ;;  %v4882_v56 = vpack.c.bf16 %v896_v49, %v896_v49 }
 0x345   :  { %v3960_v9 = vcombine.high %v1127_v2, %v1131_v3 }
 0x347   :  { %2532 = vmatpush1.bf16.msra.mxu0 %v3901_v13  ;;  %2614 = vmatpush1.bf16.msra.mxu1 %v3903_v14  ;;  %v1135_v13 = vld [vmem:[#allocation10 + $0x748] sm:$0xff] }
 0x348   :  { %2533 = vmatprep.subr.bf16.mxu0 %v3910_v15  ;;  %2615 = vmatprep.subr.bf16.mxu1 %v3912_v16  ;;  %v1139_v14 = vld [vmem:[#allocation10 + $0x768] sm:$0xff]  ;;  %v3957_v15 = vcombine.low %v1126_v63, %v1130_v1  ;;  %v3959_v16 = vcombine.low %v1127_v2, %v1131_v3  ;;  %v925_v63 = vld [vmem:[#allocation10 + $0xb8] sm:$0xff] }
 0x349   :  { %v3968_v19 = vcombine.high %v1135_v13, %v1139_v14  ;;  %v3967_v25 = vcombine.low %v1135_v13, %v1139_v14 }
 0x34b   :  { %2534 = vmatpush1.bf16.msra.mxu0 %v3909_v21  ;;  %2616 = vmatpush1.bf16.msra.mxu1 %v3911_v22  ;;  %v1146_v21 = vld [vmem:[#allocation10 + $0x7a0] sm:$0xff]  ;;  %v1143_v22 = vld [vmem:[#allocation10 + $0x788] sm:$0xff] }
 0x34c   :  { %2535 = vmatprep.subr.bf16.mxu0 %v3918_v23  ;;  %2617 = vmatprep.subr.bf16.mxu1 %v3920_v24  ;;  %v1147_v23 = vld [vmem:[#allocation10 + $0x7a8] sm:$0xff]  ;;  %v3965_v24 = vcombine.low %v1134_v10, %v1138_v11  ;;  %v3974_v27 = vcombine.high %v1142_v20, %v1146_v21  ;;  %v3973_v35 = vcombine.low %v1142_v20, %v1146_v21  ;;  %v933_v10 = vld [vmem:[#allocation10 + $0xf8] sm:$0xff] }
 0x34d   :  { %v3976_v28 = vcombine.high %v1143_v22, %v1147_v23  ;;  %v3975_v36 = vcombine.low %v1143_v22, %v1147_v23 }
 0x34f   :  { %2536 = vmatpush1.bf16.msra.mxu0 %v3917_v31  ;;  %2618 = vmatpush1.bf16.msra.mxu1 %v3919_v32  ;;  %v1150_v31 = vld [vmem:[#allocation10 + $0x7c0] sm:$0xff] }
 0x350   :  { %2537 = vmatprep.subr.bf16.mxu0 %v3926_v33  ;;  %2619 = vmatprep.subr.bf16.mxu1 %v3928_v34  ;;  %v1154_v32 = vld [vmem:[#allocation10 + $0x7e0] sm:$0xff]  ;;  %v1151_v33 = vld [vmem:[#allocation10 + $0x7c8] sm:$0xff] }
 0x351   :  { %v1155_v34 = vld [vmem:[#allocation10 + $0x7e8] sm:$0xff]  ;;  %v3982_v39 = vcombine.high %v1150_v31, %v1154_v32  ;;  %v3981_v44 = vcombine.low %v1150_v31, %v1154_v32 }
 0x352   :  { %v3983_v47 = vcombine.low %v1151_v33, %v1155_v34 }
 0x353   :  { %2538 = vmatpush1.bf16.msra.mxu0 %v3925_v40  ;;  %2620 = vmatpush1.bf16.msra.mxu1 %v3927_v41  ;;  %v3984_v40 = vcombine.high %v1151_v33, %v1155_v34  ;;  %v904_v41 = vld [vmem:[#allocation10 + $0x10] sm:$0xff] }
 0x354   :  { %2539 = vmatprep.subr.bf16.mxu0 %v3934_v42  ;;  %2621 = vmatprep.subr.bf16.mxu1 %v3936_v43  ;;  %v905_v42 = vld [vmem:[#allocation10 + $0x18] sm:$0xff]  ;;  %v3738_v50 = vcombine.high %v904_v41, %v908_v6  ;;  %v3737_v55 = vcombine.low %v904_v41, %v908_v6  ;;  %v952_v34 = vld [vmem:[#allocation10 + $0x190] sm:$0xff] }
 0x355   :  { %v909_v43 = vld [vmem:[#allocation10 + $0x38] sm:$0xff] }
 0x356   :  { %v3739_v57 = vcombine.low %v905_v42, %v909_v43 }
 0x357   :  { %2540 = vmatpush1.bf16.msra.mxu0 %v3933_v51  ;;  %2622 = vmatpush1.bf16.msra.mxu1 %v3935_v52  ;;  %v3740_v51 = vcombine.high %v905_v42, %v909_v43  ;;  %v912_v52 = vld [vmem:[#allocation10 + $0x50] sm:$0xff] }
 0x358   :  { %2541 = vmatprep.subr.bf16.mxu0 %v3942_v53  ;;  %2623 = vmatprep.subr.bf16.mxu1 %v3944_v54  ;;  %v916_v53 = vld [vmem:[#allocation10 + $0x70] sm:$0xff]  ;;  %v917_v54 = vld [vmem:[#allocation10 + $0x78] sm:$0xff] }
 0x359   :  { %v3746_v58 = vcombine.high %v912_v52, %v916_v53  ;;  %v3745_v1 = vcombine.low %v912_v52, %v916_v53  ;;  %v3747_v2 = vcombine.low %v913_v12, %v917_v54  ;;  %v960_v42 = vld [vmem:[#allocation10 + $0x1d0] sm:$0xff] }
 0x35a   :  { %v964_v43 = vld [vmem:[#allocation10 + $0x1f0] sm:$0xff] }
 0x35b   :  { %2542 = vmatpush1.bf16.msra.mxu0 %v3941_v59  ;;  %2624 = vmatpush1.bf16.msra.mxu1 %v3943_v60  ;;  %v3748_v59 = vcombine.high %v913_v12, %v917_v54  ;;  %v920_v60 = vld [vmem:[#allocation10 + $0x90] sm:$0xff]  ;;  %v969_v54 = vld [vmem:[#allocation10 + $0x218] sm:$0xff] }
 0x35c   :  { %2543 = vmatprep.subr.bf16.mxu0 %v3950_v61  ;;  %2625 = vmatprep.subr.bf16.mxu1 %v3952_v62  ;;  %v924_v61 = vld [vmem:[#allocation10 + $0xb0] sm:$0xff]  ;;  %v921_v62 = vld [vmem:[#allocation10 + $0x98] sm:$0xff] }
 0x35d   :  { %v3754_v3 = vcombine.high %v920_v60, %v924_v61  ;;  %v3753_v11 = vcombine.low %v920_v60, %v924_v61  ;;  %v3755_v13 = vcombine.low %v921_v62, %v925_v63  ;;  %v968_v53 = vld [vmem:[#allocation10 + $0x210] sm:$0xff] }
 0x35e   :  { %v972_v12 = vld [vmem:[#allocation10 + $0x230] sm:$0xff] }
 0x35f   :  { %2544 = vmatpush1.bf16.msra.mxu0 %v3949_v4  ;;  %2626 = vmatpush1.bf16.msra.mxu1 %v3951_v5  ;;  %v3756_v4 = vcombine.high %v921_v62, %v925_v63  ;;  %v928_v5 = vld [vmem:[#allocation10 + $0xd0] sm:$0xff]  ;;  %v977_v63 = vld [vmem:[#allocation10 + $0x258] sm:$0xff] }
 0x360   :  { %2545 = vmatprep.subr.bf16.mxu0 %v3958_v8  ;;  %2627 = vmatprep.subr.bf16.mxu1 %v3960_v9  ;;  %v932_v8 = vld [vmem:[#allocation10 + $0xf0] sm:$0xff]  ;;  %v929_v9 = vld [vmem:[#allocation10 + $0xd8] sm:$0xff] }
 0x361   :  { %v3762_v14 = vcombine.high %v928_v5, %v932_v8  ;;  %v3761_v20 = vcombine.low %v928_v5, %v932_v8  ;;  %v3763_v21 = vcombine.low %v929_v9, %v933_v10  ;;  %v976_v61 = vld [vmem:[#allocation10 + $0x250] sm:$0xff] }
 0x362   :  { %v980_v62 = vld [vmem:[#allocation10 + $0x270] sm:$0xff] }
 0x363   :  { %2546 = vmatpush1.bf16.msra.mxu0 %v3957_v15  ;;  %2628 = vmatpush1.bf16.msra.mxu1 %v3959_v16  ;;  %v3764_v15 = vcombine.high %v929_v9, %v933_v10  ;;  %v936_v16 = vld [vmem:[#allocation10 + $0x110] sm:$0xff]  ;;  %v985_v10 = vld [vmem:[#allocation10 + $0x298] sm:$0xff] }
 0x364   :  { %2547 = vmatprep.subr.bf16.mxu0 %v3966_v18  ;;  %2629 = vmatprep.subr.bf16.mxu1 %v3968_v19  ;;  %v940_v18 = vld [vmem:[#allocation10 + $0x130] sm:$0xff]  ;;  %v941_v19 = vld [vmem:[#allocation10 + $0x138] sm:$0xff] }
 0x365   :  { %v3770_v22 = vcombine.high %v936_v16, %v940_v18  ;;  %v984_v8 = vld [vmem:[#allocation10 + $0x290] sm:$0xff] }
 0x366   :  { %v988_v9 = vld [vmem:[#allocation10 + $0x2b0] sm:$0xff] }
 0x367   :  { %2548 = vmatpush1.bf16.msra.mxu0 %v3965_v24  ;;  %2630 = vmatpush1.bf16.msra.mxu1 %v3967_v25  ;;  %v944_v24 = vld [vmem:[#allocation10 + $0x150] sm:$0xff] }
 0x368   :  { %2549 = vmatprep.subr.bf16.mxu0 %v3974_v27  ;;  %2631 = vmatprep.subr.bf16.mxu1 %v3976_v28  ;;  %v948_v25 = vld [vmem:[#allocation10 + $0x170] sm:$0xff]  ;;  %v949_v27 = vld [vmem:[#allocation10 + $0x178] sm:$0xff]  ;;  %v3769_v28 = vcombine.low %v936_v16, %v940_v18 }
 0x369   :  { %v3778_v32 = vcombine.high %v944_v24, %v948_v25  ;;  %v3780_v33 = vcombine.high %v945_v26, %v949_v27  ;;  %v992_v18 = vld [vmem:[#allocation10 + $0x2d0] sm:$0xff] }
 0x36b   :  { %2550 = vmatpush1.bf16.msra.mxu0 %v3973_v35  ;;  %2632 = vmatpush1.bf16.msra.mxu1 %v3975_v36  ;;  %v956_v35 = vld [vmem:[#allocation10 + $0x1b0] sm:$0xff]  ;;  %v953_v36 = vld [vmem:[#allocation10 + $0x198] sm:$0xff] }
 0x36c   :  { %2551 = vmatprep.subr.bf16.mxu0 %v3982_v39  ;;  %2633 = vmatprep.subr.bf16.mxu1 %v3984_v40  ;;  %v3777_v39 = vcombine.low %v944_v24, %v948_v25  ;;  %v3779_v40 = vcombine.low %v945_v26, %v949_v27  ;;  %v3786_v41 = vcombine.high %v952_v34, %v956_v35  ;;  %v1000_v25 = vld [vmem:[#allocation10 + $0x310] sm:$0xff]  ;;  %v1001_v27 = vld [vmem:[#allocation10 + $0x318] sm:$0xff] }
 0x36d   :  { %v3788_v6 = vcombine.high %v953_v36, %v957_v38  ;;  %v3785_v49 = vcombine.low %v952_v34, %v956_v35  ;;  %v1004_v26 = vld [vmem:[#allocation10 + $0x330] sm:$0xff] }
 0x36e   :  { %v1008_v35 = vld [vmem:[#allocation10 + $0x350] sm:$0xff] }
 0x36f   :  { %2552 = vmatpush1.bf16.msra.mxu0 %v3981_v44  ;;  %2634 = vmatpush1.bf16.msra.mxu1 %v3983_v47  ;;  %v961_v44 = vld [vmem:[#allocation10 + $0x1d8] sm:$0xff] }
 0x370   :  { %2644 = vmatprep.subr.bf16.mxu0 %v3738_v50  ;;  %2726 = vmatprep.subr.bf16.mxu1 %v3740_v51  ;;  %v965_v47 = vld [vmem:[#allocation10 + $0x1f8] sm:$0xff]  ;;  %v3787_v50 = vcombine.low %v953_v36, %v957_v38  ;;  %v3794_v51 = vcombine.high %v960_v42, %v964_v43  ;;  %v1012_v36 = vld [vmem:[#allocation10 + $0x370] sm:$0xff] }
 0x371   :  { %v3796_v52 = vcombine.high %v961_v44, %v965_v47  ;;  %v1009_v38 = vld [vmem:[#allocation10 + $0x358] sm:$0xff] }
 0x372   :  { %2554 = vmatmul.mubr.bf16.vlgmr.msra.gmra.mrb[8].mxu0 %v4882_v56  ;;  %2636 = vmatmul.mubr.bf16.vlgmr.msra.gmra.mrb[8].mxu1 %v4882_v56 }
 0x373   :  { %2645 = vmatpush1.bf16.msra.mxu0 %v3737_v55  ;;  %2676 = vmatprep.mubr.bf16.mxu0 %v4865_v29  ;;  %v973_v55 = vld [vmem:[#allocation10 + $0x238] sm:$0xff] }
 0x374   :  { %2727 = vmatpush1.bf16.msra.mxu1 %v3739_v57  ;;  %2758 = vmatprep.mubr.bf16.mxu1 %v4865_v29  ;;  %v937_v29 = vld [vmem:[#allocation10 + $0x118] sm:$0xff]  ;;  %v3793_v57 = vcombine.low %v960_v42, %v964_v43  ;;  %v3804_v60 = vcombine.high %v969_v54, %v973_v55  ;;  %v1016_v43 = vld [vmem:[#allocation10 + $0x390] sm:$0xff] }
 0x375   :  { %2646 = vmatprep.subr.bf16.mxu0 %v3746_v58  ;;  %2728 = vmatprep.subr.bf16.mxu1 %v3748_v59  ;;  %v3772_v23 = vcombine.high %v937_v29, %v941_v19  ;;  %v3771_v31 = vcombine.low %v937_v29, %v941_v19  ;;  %v3795_v58 = vcombine.low %v961_v44, %v965_v47  ;;  %v996_v29 = vld [vmem:[#allocation10 + $0x2f0] sm:$0xff]  ;;  %v993_v19 = vld [vmem:[#allocation10 + $0x2d8] sm:$0xff] }
 0x376   :  { %v3802_v59 = vcombine.high %v968_v53, %v972_v12  ;;  %v1020_v44 = vld [vmem:[#allocation10 + $0x3b0] sm:$0xff]  ;;  %v1017_v47 = vld [vmem:[#allocation10 + $0x398] sm:$0xff] }
 0x377   :  { %2647 = vmatpush1.bf16.msra.mxu0 %v3745_v1  ;;  %v981_v1 = vld [vmem:[#allocation10 + $0x278] sm:$0xff] }
 0x378   :  { %2729 = vmatpush1.bf16.msra.mxu1 %v3747_v2  ;;  %2648 = vmatprep.subr.bf16.mxu0 %v3754_v3  ;;  %v3801_v2 = vcombine.low %v968_v53, %v972_v12  ;;  %v3803_v3 = vcombine.low %v969_v54, %v973_v55  ;;  %v3812_v5 = vcombine.high %v977_v63, %v981_v1  ;;  %v1024_v12 = vld [vmem:[#allocation10 + $0x3d0] sm:$0xff]  ;;  %v1025_v55 = vld [vmem:[#allocation10 + $0x3d8] sm:$0xff] }
 0x379   :  { %2730 = vmatprep.subr.bf16.mxu1 %v3756_v4  ;;  %v3810_v4 = vcombine.high %v976_v61, %v980_v62  ;;  %v1028_v54 = vld [vmem:[#allocation10 + $0x3f0] sm:$0xff] }
 0x37b   :  { %2649 = vmatpush1.bf16.msra.mxu0 %v3753_v11  ;;  %v989_v11 = vld [vmem:[#allocation10 + $0x2b8] sm:$0xff] }
 0x37c   :  { %2731 = vmatpush1.bf16.msra.mxu1 %v3755_v13  ;;  %2650 = vmatprep.subr.bf16.mxu0 %v3762_v14  ;;  %v3809_v13 = vcombine.low %v976_v61, %v980_v62  ;;  %v3811_v14 = vcombine.low %v977_v63, %v981_v1  ;;  %v3820_v16 = vcombine.high %v985_v10, %v989_v11  ;;  %v1032_v62 = vld [vmem:[#allocation10 + $0x410] sm:$0xff]  ;;  %v1033_v1 = vld [vmem:[#allocation10 + $0x418] sm:$0xff] }
 0x37d   :  { %2732 = vmatprep.subr.bf16.mxu1 %v3764_v15  ;;  %v3818_v15 = vcombine.high %v984_v8, %v988_v9  ;;  %v1036_v63 = vld [vmem:[#allocation10 + $0x430] sm:$0xff] }
 0x37f   :  { %2651 = vmatpush1.bf16.msra.mxu0 %v3761_v20  ;;  %v997_v20 = vld [vmem:[#allocation10 + $0x2f8] sm:$0xff] }
 0x380   :  { %2733 = vmatpush1.bf16.msra.mxu1 %v3763_v21  ;;  %2652 = vmatprep.subr.bf16.mxu0 %v3770_v22  ;;  %v3817_v21 = vcombine.low %v984_v8, %v988_v9  ;;  %v3819_v22 = vcombine.low %v985_v10, %v989_v11  ;;  %v3828_v24 = vcombine.high %v993_v19, %v997_v20  ;;  %v1040_v9 = vld [vmem:[#allocation10 + $0x450] sm:$0xff] }
 0x381   :  { %2734 = vmatprep.subr.bf16.mxu1 %v3772_v23  ;;  %v3826_v23 = vcombine.high %v992_v18, %v996_v29  ;;  %v1044_v10 = vld [vmem:[#allocation10 + $0x470] sm:$0xff]  ;;  %v3865_v11 = vcombine.low %v1032_v62, %v1036_v63 }
 0x383   :  { %2653 = vmatpush1.bf16.msra.mxu0 %v3769_v28  ;;  %v1005_v28 = vld [vmem:[#allocation10 + $0x338] sm:$0xff] }
 0x384   :  { %2735 = vmatpush1.bf16.msra.mxu1 %v3771_v31  ;;  %2654 = vmatprep.subr.bf16.mxu0 %v3778_v32  ;;  %v3825_v31 = vcombine.low %v992_v18, %v996_v29  ;;  %v3827_v32 = vcombine.low %v993_v19, %v997_v20  ;;  %v3836_v34 = vcombine.high %v1001_v27, %v1005_v28  ;;  %v1048_v18 = vld [vmem:[#allocation10 + $0x490] sm:$0xff]  ;;  %v1049_v20 = vld [vmem:[#allocation10 + $0x498] sm:$0xff] }
 0x385   :  { %2736 = vmatprep.subr.bf16.mxu1 %v3780_v33  ;;  %v3834_v33 = vcombine.high %v1000_v25, %v1004_v26  ;;  %v1052_v29 = vld [vmem:[#allocation10 + $0x4b0] sm:$0xff] }
 0x387   :  { %2655 = vmatpush1.bf16.msra.mxu0 %v3777_v39  ;;  %v1013_v39 = vld [vmem:[#allocation10 + $0x378] sm:$0xff] }
 0x388   :  { %2737 = vmatpush1.bf16.msra.mxu1 %v3779_v40  ;;  %2656 = vmatprep.subr.bf16.mxu0 %v3786_v41  ;;  %v3833_v40 = vcombine.low %v1000_v25, %v1004_v26  ;;  %v3835_v41 = vcombine.low %v1001_v27, %v1005_v28  ;;  %v3844_v42 = vcombine.high %v1009_v38, %v1013_v39  ;;  %v1056_v26 = vld [vmem:[#allocation10 + $0x4d0] sm:$0xff]  ;;  %v1057_v28 = vld [vmem:[#allocation10 + $0x4d8] sm:$0xff] }
 0x389   :  { %2738 = vmatprep.subr.bf16.mxu1 %v3788_v6  ;;  %v3842_v6 = vcombine.high %v1008_v35, %v1012_v36  ;;  %v1060_v27 = vld [vmem:[#allocation10 + $0x4f0] sm:$0xff] }
 0x38b   :  { %2657 = vmatpush1.bf16.msra.mxu0 %v3785_v49  ;;  %v1021_v49 = vld [vmem:[#allocation10 + $0x3b8] sm:$0xff] }
 0x38c   :  { %2739 = vmatpush1.bf16.msra.mxu1 %v3787_v50  ;;  %2658 = vmatprep.subr.bf16.mxu0 %v3794_v51  ;;  %v3841_v50 = vcombine.low %v1008_v35, %v1012_v36  ;;  %v3843_v51 = vcombine.low %v1009_v38, %v1013_v39  ;;  %v3852_v53 = vcombine.high %v1017_v47, %v1021_v49  ;;  %v1064_v35 = vld [vmem:[#allocation10 + $0x510] sm:$0xff]  ;;  %v1065_v38 = vld [vmem:[#allocation10 + $0x518] sm:$0xff] }
 0x38d   :  { %2740 = vmatprep.subr.bf16.mxu1 %v3796_v52  ;;  %v3850_v52 = vcombine.high %v1016_v43, %v1020_v44  ;;  %v1068_v36 = vld [vmem:[#allocation10 + $0x530] sm:$0xff]  ;;  %v1069_v39 = vld [vmem:[#allocation10 + $0x538] sm:$0xff] }
 0x38f   :  { %2659 = vmatpush1.bf16.msra.mxu0 %v3793_v57  ;;  %v1029_v57 = vld [vmem:[#allocation10 + $0x3f8] sm:$0xff] }
 0x390   :  { %2741 = vmatpush1.bf16.msra.mxu1 %v3795_v58  ;;  %2660 = vmatprep.subr.bf16.mxu0 %v3802_v59  ;;  %v3849_v58 = vcombine.low %v1016_v43, %v1020_v44  ;;  %v3851_v59 = vcombine.low %v1017_v47, %v1021_v49  ;;  %v3860_v61 = vcombine.high %v1025_v55, %v1029_v57  ;;  %v1076_v43 = vld [vmem:[#allocation10 + $0x570] sm:$0xff]  ;;  %v1073_v44 = vld [vmem:[#allocation10 + $0x558] sm:$0xff] }
 0x391   :  { %2742 = vmatprep.subr.bf16.mxu1 %v3804_v60  ;;  %v3858_v60 = vcombine.high %v1024_v12, %v1028_v54  ;;  %v1077_v47 = vld [vmem:[#allocation10 + $0x578] sm:$0xff]  ;;  %v3897_v49 = vcombine.low %v1064_v35, %v1068_v36 }
 0x393   :  { %2661 = vmatpush1.bf16.msra.mxu0 %v3801_v2  ;;  %v1037_v2 = vld [vmem:[#allocation10 + $0x438] sm:$0xff] }
 0x394   :  { %2743 = vmatpush1.bf16.msra.mxu1 %v3803_v3  ;;  %2662 = vmatprep.subr.bf16.mxu0 %v3810_v4  ;;  %v3857_v3 = vcombine.low %v1024_v12, %v1028_v54  ;;  %v3859_v4 = vcombine.low %v1025_v55, %v1029_v57  ;;  %v3868_v8 = vcombine.high %v1033_v1, %v1037_v2  ;;  %v1084_v12 = vld [vmem:[#allocation10 + $0x5b0] sm:$0xff]  ;;  %v1081_v54 = vld [vmem:[#allocation10 + $0x598] sm:$0xff] }
 0x395   :  { %2744 = vmatprep.subr.bf16.mxu1 %v3812_v5  ;;  %v3866_v5 = vcombine.high %v1032_v62, %v1036_v63  ;;  %v1085_v55 = vld [vmem:[#allocation10 + $0x5b8] sm:$0xff]  ;;  %v1092_v62 = vld [vmem:[#allocation10 + $0x5f0] sm:$0xff] }
 0x396   :  { %v1089_v63 = vld [vmem:[#allocation10 + $0x5d8] sm:$0xff] }
 0x397   :  { %2663 = vmatpush1.bf16.msra.mxu0 %v3809_v13  ;;  %v1041_v13 = vld [vmem:[#allocation10 + $0x458] sm:$0xff] }
 0x398   :  { %2745 = vmatpush1.bf16.msra.mxu1 %v3811_v14  ;;  %2664 = vmatprep.subr.bf16.mxu0 %v3818_v15  ;;  %v1045_v14 = vld [vmem:[#allocation10 + $0x478] sm:$0xff]  ;;  %v3867_v15 = vcombine.low %v1033_v1, %v1037_v2 }
 0x399   :  { %2746 = vmatprep.subr.bf16.mxu1 %v3820_v16  ;;  %v3874_v16 = vcombine.high %v1040_v9, %v1044_v10  ;;  %v3876_v19 = vcombine.high %v1041_v13, %v1045_v14  ;;  %v1093_v1 = vld [vmem:[#allocation10 + $0x5f8] sm:$0xff] }
 0x39b   :  { %2665 = vmatpush1.bf16.msra.mxu0 %v3817_v21  ;;  %v1053_v21 = vld [vmem:[#allocation10 + $0x4b8] sm:$0xff] }
 0x39c   :  { %2747 = vmatpush1.bf16.msra.mxu1 %v3819_v22  ;;  %2666 = vmatprep.subr.bf16.mxu0 %v3826_v23  ;;  %v3873_v22 = vcombine.low %v1040_v9, %v1044_v10  ;;  %v3875_v23 = vcombine.low %v1041_v13, %v1045_v14  ;;  %v3884_v25 = vcombine.high %v1049_v20, %v1053_v21  ;;  %v1100_v9 = vld [vmem:[#allocation10 + $0x630] sm:$0xff]  ;;  %v1097_v10 = vld [vmem:[#allocation10 + $0x618] sm:$0xff] }
 0x39d   :  { %2748 = vmatprep.subr.bf16.mxu1 %v3828_v24  ;;  %v3882_v24 = vcombine.high %v1048_v18, %v1052_v29  ;;  %v3923_v14 = vcombine.low %v1089_v63, %v1093_v1 }
 0x39f   :  { %2667 = vmatpush1.bf16.msra.mxu0 %v3825_v31  ;;  %v1061_v31 = vld [vmem:[#allocation10 + $0x4f8] sm:$0xff] }
 0x3a0   :  { %2749 = vmatpush1.bf16.msra.mxu1 %v3827_v32  ;;  %2668 = vmatprep.subr.bf16.mxu0 %v3834_v33  ;;  %v3881_v32 = vcombine.low %v1048_v18, %v1052_v29  ;;  %v3890_v33 = vcombine.high %v1056_v26, %v1060_v27  ;;  %v1104_v18 = vld [vmem:[#allocation10 + $0x650] sm:$0xff] }
 0x3a1   :  { %2750 = vmatprep.subr.bf16.mxu1 %v3836_v34  ;;  %v3892_v34 = vcombine.high %v1057_v28, %v1061_v31  ;;  %v1108_v29 = vld [vmem:[#allocation10 + $0x670] sm:$0xff] }
 0x3a3   :  { %2669 = vmatpush1.bf16.msra.mxu0 %v3833_v40  ;;  %v3891_v40 = vcombine.low %v1057_v28, %v1061_v31  ;;  %v1117_v28 = vld [vmem:[#allocation10 + $0x6b8] sm:$0xff]  ;;  %v3937_v31 = vcombine.low %v1104_v18, %v1108_v29 }
 0x3a4   :  { %2751 = vmatpush1.bf16.msra.mxu1 %v3835_v41  ;;  %2670 = vmatprep.subr.bf16.mxu0 %v3842_v6  ;;  %v3898_v41 = vcombine.high %v1064_v35, %v1068_v36  ;;  %v3900_v6 = vcombine.high %v1065_v38, %v1069_v39  ;;  %v1124_v35 = vld [vmem:[#allocation10 + $0x6f0] sm:$0xff]  ;;  %v1121_v36 = vld [vmem:[#allocation10 + $0x6d8] sm:$0xff] }
 0x3a5   :  { %2752 = vmatprep.subr.bf16.mxu1 %v3844_v42  ;;  %v1072_v42 = vld [vmem:[#allocation10 + $0x550] sm:$0xff] }
 0x3a6   :  { %v3905_v57 = vcombine.low %v1072_v42, %v1076_v43 }
 0x3a7   :  { %2671 = vmatpush1.bf16.msra.mxu0 %v3841_v50  ;;  %v3899_v50 = vcombine.low %v1065_v38, %v1069_v39  ;;  %v1125_v38 = vld [vmem:[#allocation10 + $0x6f8] sm:$0xff] }
 0x3a8   :  { %2753 = vmatpush1.bf16.msra.mxu1 %v3843_v51  ;;  %2672 = vmatprep.subr.bf16.mxu0 %v3850_v52  ;;  %v3906_v51 = vcombine.high %v1072_v42, %v1076_v43  ;;  %v3908_v52 = vcombine.high %v1073_v44, %v1077_v47  ;;  %v1132_v42 = vld [vmem:[#allocation10 + $0x730] sm:$0xff]  ;;  %v1129_v43 = vld [vmem:[#allocation10 + $0x718] sm:$0xff] }
 0x3a9   :  { %2754 = vmatprep.subr.bf16.mxu1 %v3852_v53  ;;  %v1080_v53 = vld [vmem:[#allocation10 + $0x590] sm:$0xff] }
 0x3aa   :  { %v3913_v2 = vcombine.low %v1080_v53, %v1084_v12 }
 0x3ab   :  { %2673 = vmatpush1.bf16.msra.mxu0 %v3849_v58  ;;  %v3907_v58 = vcombine.low %v1073_v44, %v1077_v47  ;;  %v1133_v44 = vld [vmem:[#allocation10 + $0x738] sm:$0xff] }
 0x3ac   :  { %2755 = vmatpush1.bf16.msra.mxu1 %v3851_v59  ;;  %2674 = vmatprep.subr.bf16.mxu0 %v3858_v60  ;;  %v3914_v59 = vcombine.high %v1080_v53, %v1084_v12  ;;  %v3916_v60 = vcombine.high %v1081_v54, %v1085_v55  ;;  %v1140_v53 = vld [vmem:[#allocation10 + $0x770] sm:$0xff]  ;;  %v1137_v12 = vld [vmem:[#allocation10 + $0x758] sm:$0xff] }
 0x3ad   :  { %2756 = vmatprep.subr.bf16.mxu1 %v3860_v61  ;;  %v1088_v61 = vld [vmem:[#allocation10 + $0x5d0] sm:$0xff] }
 0x3ae   :  { %v3921_v13 = vcombine.low %v1088_v61, %v1092_v62 }
 0x3af   :  { %2675 = vmatpush1.bf16.msra.mxu0 %v3857_v3  ;;  %v3915_v3 = vcombine.low %v1081_v54, %v1085_v55  ;;  %v1141_v54 = vld [vmem:[#allocation10 + $0x778] sm:$0xff] }
 0x3b0   :  { %2757 = vmatpush1.bf16.msra.mxu1 %v3859_v4  ;;  %2685 = vmatprep.subr.bf16.mxu0 %v3866_v5  ;;  %v3922_v4 = vcombine.high %v1088_v61, %v1092_v62  ;;  %v3924_v5 = vcombine.high %v1089_v63, %v1093_v1  ;;  %v1148_v61 = vld [vmem:[#allocation10 + $0x7b0] sm:$0xff]  ;;  %v1145_v62 = vld [vmem:[#allocation10 + $0x798] sm:$0xff] }
 0x3b1   :  { %2767 = vmatprep.subr.bf16.mxu1 %v3868_v8  ;;  %v1096_v8 = vld [vmem:[#allocation10 + $0x610] sm:$0xff]  ;;  %v1149_v63 = vld [vmem:[#allocation10 + $0x7b8] sm:$0xff] }
 0x3b2   :  { %2677 = vmatmul.mubr.bf16.vlgmr.msra.gmra.mrb[12].mxu0 %v4867_v30 }
 0x3b3   :  { %2759 = vmatmul.mubr.bf16.vlgmr.msra.gmra.mrb[12].mxu1 %v4867_v30  ;;  %2686 = vmatpush1.bf16.msra.mxu0 %v3865_v11  ;;  %v3883_v30 = vcombine.low %v1049_v20, %v1053_v21  ;;  %v1101_v11 = vld [vmem:[#allocation10 + $0x638] sm:$0xff]  ;;  %v3929_v21 = vcombine.low %v1096_v8, %v1100_v9 }
 0x3b4   :  { %2717 = vmatprep.mubr.bf16.mxu0 %v4871_v37  ;;  %2768 = vmatpush1.bf16.msra.mxu1 %v3867_v15  ;;  %v3930_v15 = vcombine.high %v1096_v8, %v1100_v9  ;;  %v1109_v20 = vld [vmem:[#allocation10 + $0x678] sm:$0xff]  ;;  %v1156_v8 = vld [vmem:[#allocation10 + $0x7f0] sm:$0xff] }
 0x3b5   :  { %2799 = vmatprep.mubr.bf16.mxu1 %v4871_v37  ;;  %2687 = vmatprep.subr.bf16.mxu0 %v3874_v16  ;;  %v3889_v37 = vcombine.low %v1056_v26, %v1060_v27  ;;  %v3932_v16 = vcombine.high %v1097_v10, %v1101_v11  ;;  %v1116_v26 = vld [vmem:[#allocation10 + $0x6b0] sm:$0xff]  ;;  %v1113_v27 = vld [vmem:[#allocation10 + $0x698] sm:$0xff] }
 0x3b6   :  { %2769 = vmatprep.subr.bf16.mxu1 %v3876_v19  ;;  %v1105_v19 = vld [vmem:[#allocation10 + $0x658] sm:$0xff] }
 0x3b7   :  { %2688 = vmatpush1.bf16.msra.mxu0 %v3873_v22  ;;  %v3931_v22 = vcombine.low %v1097_v10, %v1101_v11  ;;  %v1153_v9 = vld [vmem:[#allocation10 + $0x7d8] sm:$0xff] }
 0x3b8   :  { %2770 = vmatpush1.bf16.msra.mxu1 %v3875_v23  ;;  %2689 = vmatprep.subr.bf16.mxu0 %v3882_v24  ;;  %v3938_v23 = vcombine.high %v1104_v18, %v1108_v29  ;;  %v3940_v24 = vcombine.high %v1105_v19, %v1109_v20  ;;  %v1157_v10 = vld [vmem:[#allocation10 + $0x7f8] sm:$0xff]  ;;  %v4380_v29 = vld [vmem:[#allocation11 + $0x40] sm:$0xff]  }
 0x3b9   :  { %2771 = vmatprep.subr.bf16.mxu1 %v3884_v25  ;;  %v1112_v25 = vld [vmem:[#allocation10 + $0x690] sm:$0xff]  ;;  %v3987_v18 = vcombine.low %v1153_v9, %v1157_v10 }
 0x3ba   :  { %v3945_v39 = vcombine.low %v1112_v25, %v1116_v26 }
 0x3bb   :  { %2690 = vmatpush1.bf16.msra.mxu0 %v3881_v32  ;;  %v3939_v32 = vcombine.low %v1105_v19, %v1109_v20  ;;  %v4381_v19 = vld [vmem:[#allocation11 + $0xc0] sm:$0xff]  }
 0x3bc   :  { %2772 = vmatpush1.bf16.msra.mxu1 %v3883_v30  ;;  %2691 = vmatprep.subr.bf16.mxu0 %v3890_v33  ;;  %v3946_v30 = vcombine.high %v1112_v25, %v1116_v26  ;;  %v3948_v33 = vcombine.high %v1113_v27, %v1117_v28  ;;  %v4382_v20 = vld [vmem:[#allocation11] sm:$0xff]   ;;  %v4387_v25 = vld [vmem:[#allocation11 + $0x88] sm:$0xff]   ;;  %v4388_v26 = vld [vmem:[#allocation11 + $0x50] sm:$0xff]  }
 0x3bd   :  { %2773 = vmatprep.subr.bf16.mxu1 %v3892_v34  ;;  %v1120_v34 = vld [vmem:[#allocation10 + $0x6d0] sm:$0xff] }
 0x3be   :  { %v3953_v47 = vcombine.low %v1120_v34, %v1124_v35 }
 0x3bf   :  { %2692 = vmatpush1.bf16.msra.mxu0 %v3889_v37  ;;  %v3947_v37 = vcombine.low %v1113_v27, %v1117_v28  ;;  %v4389_v27 = vld [vmem:[#allocation11 + $0xd0] sm:$0xff]  }
 0x3c0   :  { %2774 = vmatpush1.bf16.msra.mxu1 %v3891_v40  ;;  %2693 = vmatprep.subr.bf16.mxu0 %v3898_v41  ;;  %v3954_v40 = vcombine.high %v1120_v34, %v1124_v35  ;;  %v3956_v41 = vcombine.high %v1121_v36, %v1125_v38  ;;  %v4390_v28 = vld [vmem:[#allocation11 + $0x10] sm:$0xff]   ;;  %v4396_v34 = vld [vmem:[#allocation11 + $0x60] sm:$0xff]  }
 0x3c1   :  { %2775 = vmatprep.subr.bf16.mxu1 %v3900_v6  ;;  %v1128_v6 = vld [vmem:[#allocation10 + $0x710] sm:$0xff]  ;;  %v4397_v35 = vld [vmem:[#allocation11 + $0xe0] sm:$0xff]  }
 0x3c2   :  { %v3961_v55 = vcombine.low %v1128_v6, %v1132_v42 }
 0x3c3   :  { %2694 = vmatpush1.bf16.msra.mxu0 %v3897_v49  ;;  %v3955_v49 = vcombine.low %v1121_v36, %v1125_v38  ;;  %v4398_v36 = vld [vmem:[#allocation11 + $0x20] sm:$0xff]  }
 0x3c4   :  { %2776 = vmatpush1.bf16.msra.mxu1 %v3899_v50  ;;  %2695 = vmatprep.subr.bf16.mxu0 %v3906_v51  ;;  %v3962_v50 = vcombine.high %v1128_v6, %v1132_v42  ;;  %v3964_v51 = vcombine.high %v1129_v43, %v1133_v44  ;;  %v4399_v38 = vld [vmem:[#allocation11 + $0xa0] sm:$0xff]   ;;  %v4404_v6 = vld [vmem:[#allocation11 + $0x70] sm:$0xff]  }
 0x3c5   :  { %2777 = vmatprep.subr.bf16.mxu1 %v3908_v52  ;;  %v1136_v52 = vld [vmem:[#allocation10 + $0x750] sm:$0xff] }
 0x3c6   :  { %v3969_v1 = vcombine.low %v1136_v52, %v1140_v53  ;;  %v4405_v42 = vld [vmem:[#allocation11 + $0xf0] sm:$0xff]  }
 0x3c7   :  { %2696 = vmatpush1.bf16.msra.mxu0 %v3905_v57  ;;  %v3963_v57 = vcombine.low %v1129_v43, %v1133_v44  ;;  %v4406_v43 = vld [vmem:[#allocation11 + $0x30] sm:$0xff]  }
 0x3c8   :  { %2778 = vmatpush1.bf16.msra.mxu1 %v3907_v58  ;;  %2697 = vmatprep.subr.bf16.mxu0 %v3914_v59  ;;  %v3970_v58 = vcombine.high %v1136_v52, %v1140_v53  ;;  %v3972_v59 = vcombine.high %v1137_v12, %v1141_v54  ;;  %v4407_v44 = vld [vmem:[#allocation11 + $0xb0] sm:$0xff]   ;;  %v4412_v52 = vld [vmem:[#allocation11 + $0x140] sm:$0xff]  }
 0x3c9   :  { %2779 = vmatprep.subr.bf16.mxu1 %v3916_v60  ;;  %v1144_v60 = vld [vmem:[#allocation10 + $0x790] sm:$0xff]  ;;  %v4413_v53 = vld [vmem:[#allocation11 + $0x1c0] sm:$0xff]  }
 0x3ca   :  { %v3977_v11 = vcombine.low %v1144_v60, %v1148_v61 }
 0x3cb   :  { %2698 = vmatpush1.bf16.msra.mxu0 %v3913_v2  ;;  %v3971_v2 = vcombine.low %v1137_v12, %v1141_v54  ;;  %v4897_v12 = vld [vmem:[%s4953_s8] sm:$0xff] }
 0x3cc   :  { %2780 = vmatpush1.bf16.msra.mxu1 %v3915_v3  ;;  %2699 = vmatprep.subr.bf16.mxu0 %v3922_v4  ;;  %v3978_v3 = vcombine.high %v1144_v60, %v1148_v61  ;;  %v3980_v4 = vcombine.high %v1145_v62, %v1149_v63  ;;  %v1163_v54 = vrot.slane %v4897_v12, %v4840_v46 }
 0x3cd   :  { %2781 = vmatprep.subr.bf16.mxu1 %v3924_v5  ;;  %v1152_v5 = vld [vmem:[#allocation10 + $0x7d0] sm:$0xff] }
 0x3cf   :  { %2700 = vmatpush1.bf16.msra.mxu0 %v3921_v13  ;;  %v3979_v13 = vcombine.low %v1145_v62, %v1149_v63 }
 0x3d0   :  { %2782 = vmatpush1.bf16.msra.mxu1 %v3923_v14  ;;  %2701 = vmatprep.subr.bf16.mxu0 %v3930_v15  ;;  %v3986_v14 = vcombine.high %v1152_v5, %v1156_v8  ;;  %v3988_v15 = vcombine.high %v1153_v9, %v1157_v10 }
 0x3d1   :  { %2783 = vmatprep.subr.bf16.mxu1 %v3932_v16  ;;  %v3985_v16 = vcombine.low %v1152_v5, %v1156_v8 }
 0x3d3   :  { %2702 = vmatpush1.bf16.msra.mxu0 %v3929_v21  ;;  %v4383_v21 = vld [vmem:[#allocation11 + $0x80] sm:$0xff]  }
 0x3d4   :  { %2784 = vmatpush1.bf16.msra.mxu1 %v3931_v22  ;;  %2703 = vmatprep.subr.bf16.mxu0 %v3938_v23  ;;  %v4384_v22 = vld [vmem:[#allocation11 + $0x48] sm:$0xff]  }
 0x3d5   :  { %2785 = vmatprep.subr.bf16.mxu1 %v3940_v24  ;;  %v4385_v23 = vld [vmem:[#allocation11 + $0xc8] sm:$0xff]  }
 0x3d6   :  { %v4386_v24 = vld [vmem:[#allocation11 + $0x8] sm:$0xff]  }
 0x3d7   :  { %2704 = vmatpush1.bf16.msra.mxu0 %v3937_v31  ;;  %v4391_v31 = vld [vmem:[#allocation11 + $0x90] sm:$0xff]  }
 0x3d8   :  { %2786 = vmatpush1.bf16.msra.mxu1 %v3939_v32  ;;  %2705 = vmatprep.subr.bf16.mxu0 %v3946_v30  ;;  %v4392_v32 = vld [vmem:[#allocation11 + $0x58] sm:$0xff]  }
 0x3d9   :  { %2787 = vmatprep.subr.bf16.mxu1 %v3948_v33  ;;  %v4393_v30 = vld [vmem:[#allocation11 + $0xd8] sm:$0xff]  }
 0x3da   :  { %v4394_v33 = vld [vmem:[#allocation11 + $0x18] sm:$0xff]  }
 0x3db   :  { %2706 = vmatpush1.bf16.msra.mxu0 %v3945_v39  ;;  %v4400_v39 = vld [vmem:[#allocation11 + $0x68] sm:$0xff]  }
 0x3dc   :  { %2788 = vmatpush1.bf16.msra.mxu1 %v3947_v37  ;;  %2707 = vmatprep.subr.bf16.mxu0 %v3954_v40  ;;  %v4401_v37 = vld [vmem:[#allocation11 + $0xe8] sm:$0xff]  }
 0x3dd   :  { %2789 = vmatprep.subr.bf16.mxu1 %v3956_v41  ;;  %v4402_v40 = vld [vmem:[#allocation11 + $0x28] sm:$0xff]  }
 0x3de   :  { %v4403_v41 = vld [vmem:[#allocation11 + $0xa8] sm:$0xff]  }
 0x3df   :  { %2708 = vmatpush1.bf16.msra.mxu0 %v3953_v47  ;;  %v4408_v47 = vld [vmem:[#allocation11 + $0x78] sm:$0xff]  }
 0x3e0   :  { %2790 = vmatpush1.bf16.msra.mxu1 %v3955_v49  ;;  %2709 = vmatprep.subr.bf16.mxu0 %v3962_v50  ;;  %v4409_v49 = vld [vmem:[#allocation11 + $0xf8] sm:$0xff]  }
 0x3e1   :  { %2791 = vmatprep.subr.bf16.mxu1 %v3964_v51  ;;  %v4410_v50 = vld [vmem:[#allocation11 + $0x38] sm:$0xff]  }
 0x3e2   :  { %v4411_v51 = vld [vmem:[#allocation11 + $0xb8] sm:$0xff]  }
 0x3e3   :  { %2710 = vmatpush1.bf16.msra.mxu0 %v3961_v55  ;;  %v1171_v55 = vrot.slane %v4897_v12, %v482_v17 }
 0x3e4   :  { %2792 = vmatpush1.bf16.msra.mxu1 %v3963_v57  ;;  %2711 = vmatprep.subr.bf16.mxu0 %v3970_v58  ;;  %v1167_v57 = vrot.slane %v4897_v12, %v4846_v48  ;;  %v1175_v58 = vrot.slane %v4897_v12, %v486_v7  ;;  %v4415_v7 = vld [vmem:[#allocation11 + $0x180] sm:$0xff]  }
 0x3e5   :  { %2793 = vmatprep.subr.bf16.mxu1 %v3972_v59 }
 0x3e7   :  { %2712 = vmatpush1.bf16.msra.mxu0 %v3969_v1 }
 0x3e8   :  { %2794 = vmatpush1.bf16.msra.mxu1 %v3971_v2  ;;  %2713 = vmatprep.subr.bf16.mxu0 %v3978_v3 }
 0x3e9   :  { %2795 = vmatprep.subr.bf16.mxu1 %v3980_v4 }
 0x3eb   :  { %2714 = vmatpush1.bf16.msra.mxu0 %v3977_v11 }
 0x3ec   :  { %2796 = vmatpush1.bf16.msra.mxu1 %v3979_v13  ;;  %2715 = vmatprep.subr.bf16.mxu0 %v3986_v14  ;;  %v4414_v14 = vld [vmem:[#allocation11 + $0x100] sm:$0xff]  }
 0x3ed   :  { %2797 = vmatprep.subr.bf16.mxu1 %v3988_v15 }
 0x3ef   :  { %2716 = vmatpush1.bf16.msra.mxu0 %v3985_v16 }
 0x3f0   :  { %2798 = vmatpush1.bf16.msra.mxu1 %v3987_v18  ;;  %4072 = vmatprep.subr.bf16.mxu0 %v4380_v29  ;;  %v4416_v18 = vld [vmem:[#allocation11 + $0x148] sm:$0xff]  }
 0x3f1   :  { %4094 = vmatprep.subr.bf16.mxu1 %v4381_v19  ;;  %v4417_v29 = vld [vmem:[#allocation11 + $0x1c8] sm:$0xff]  }
 0x3f2   :  { %2718 = vmatmul.mubr.bf16.vlgmr.msra.gmra.mrb[12].mxu0 %v4882_v56  ;;  %v4418_v19 = vld [vmem:[#allocation11 + $0x108] sm:$0xff]  }
 0x3f3   :  { %2800 = vmatmul.mubr.bf16.vlgmr.msra.gmra.mrb[12].mxu1 %v4882_v56  ;;  %4073 = vmatpush3.bf16.msra.mxu0 %v4382_v20  ;;  %v4395_v56 = vld [vmem:[#allocation11 + $0x98] sm:$0xff]   ;;  %v4419_v20 = vld [vmem:[#allocation11 + $0x188] sm:$0xff]  }
 0x3f4   :  { %4095 = vmatpush3.bf16.msra.mxu1 %v4383_v21  ;;  %4074 = vmatprep.subr.bf16.mxu0 %v4384_v22  ;;  %v4420_v21 = vld [vmem:[#allocation11 + $0x150] sm:$0xff]  }
 0x3f5   :  { %4096 = vmatprep.subr.bf16.mxu1 %v4385_v23  ;;  %v4421_v22 = vld [vmem:[#allocation11 + $0x1d0] sm:$0xff]  }
 0x3f6   :  { %v4422_v23 = vld [vmem:[#allocation11 + $0x110] sm:$0xff]  }
 0x3f7   :  { %4075 = vmatpush3.bf16.msra.mxu0 %v4386_v24  ;;  %v4423_v24 = vld [vmem:[#allocation11 + $0x190] sm:$0xff]  }
 0x3f8   :  { %4097 = vmatpush3.bf16.msra.mxu1 %v4387_v25  ;;  %4076 = vmatprep.subr.bf16.mxu0 %v4388_v26  ;;  %v4424_v25 = vld [vmem:[#allocation11 + $0x158] sm:$0xff]  }
 0x3f9   :  { %4098 = vmatprep.subr.bf16.mxu1 %v4389_v27  ;;  %v4425_v26 = vld [vmem:[#allocation11 + $0x1d8] sm:$0xff]  }
 0x3fa   :  { %v4426_v27 = vld [vmem:[#allocation11 + $0x118] sm:$0xff]  }
 0x3fb   :  { %4077 = vmatpush3.bf16.msra.mxu0 %v4390_v28  ;;  %v4427_v28 = vld [vmem:[#allocation11 + $0x198] sm:$0xff]  }
 0x3fc   :  { %4099 = vmatpush3.bf16.msra.mxu1 %v4391_v31  ;;  %4078 = vmatprep.subr.bf16.mxu0 %v4392_v32  ;;  %v4428_v31 = vld [vmem:[#allocation11 + $0x160] sm:$0xff]  }
 0x3fd   :  { %4100 = vmatprep.subr.bf16.mxu1 %v4393_v30  ;;  %v4429_v32 = vld [vmem:[#allocation11 + $0x1e0] sm:$0xff]  }
 0x3fe   :  { %v4430_v30 = vld [vmem:[#allocation11 + $0x120] sm:$0xff]  }
 0x3ff   :  { %4079 = vmatpush3.bf16.msra.mxu0 %v4394_v33  ;;  %v4431_v33 = vld [vmem:[#allocation11 + $0x1a0] sm:$0xff]  }
 0x400   :  { %4101 = vmatpush3.bf16.msra.mxu1 %v4395_v56  ;;  %4080 = vmatprep.subr.bf16.mxu0 %v4396_v34  ;;  %v4432_v56 = vld [vmem:[#allocation11 + $0x168] sm:$0xff]  }
 0x401   :  { %4102 = vmatprep.subr.bf16.mxu1 %v4397_v35  ;;  %v4433_v34 = vld [vmem:[#allocation11 + $0x1e8] sm:$0xff]  }
 0x402   :  { %v4434_v35 = vld [vmem:[#allocation11 + $0x128] sm:$0xff]  }
 0x403   :  { %4081 = vmatpush3.bf16.msra.mxu0 %v4398_v36  ;;  %v4435_v36 = vld [vmem:[#allocation11 + $0x1a8] sm:$0xff]  }
 0x404   :  { %4103 = vmatpush3.bf16.msra.mxu1 %v4399_v38  ;;  %4082 = vmatprep.subr.bf16.mxu0 %v4400_v39  ;;  %v4436_v38 = vld [vmem:[#allocation11 + $0x170] sm:$0xff]  }
 0x405   :  { %4104 = vmatprep.subr.bf16.mxu1 %v4401_v37  ;;  %v4437_v39 = vld [vmem:[#allocation11 + $0x1f0] sm:$0xff]  }
 0x406   :  { %v4438_v37 = vld [vmem:[#allocation11 + $0x130] sm:$0xff]  }
 0x407   :  { %4083 = vmatpush3.bf16.msra.mxu0 %v4402_v40  ;;  %v4439_v40 = vld [vmem:[#allocation11 + $0x1b0] sm:$0xff]  }
 0x408   :  { %4105 = vmatpush3.bf16.msra.mxu1 %v4403_v41  ;;  %4084 = vmatprep.subr.bf16.mxu0 %v4404_v6  ;;  %v4440_v41 = vld [vmem:[#allocation11 + $0x178] sm:$0xff]  }
 0x409   :  { %4106 = vmatprep.subr.bf16.mxu1 %v4405_v42  ;;  %v4441_v6 = vld [vmem:[#allocation11 + $0x1f8] sm:$0xff]  }
 0x40a   :  { %v4442_v42 = vld [vmem:[#allocation11 + $0x138] sm:$0xff]  }
 0x40b   :  { %4085 = vmatpush3.bf16.msra.mxu0 %v4406_v43  ;;  %v4443_v43 = vld [vmem:[#allocation11 + $0x1b8] sm:$0xff]  }
 0x40c   :  { %4107 = vmatpush3.bf16.msra.mxu1 %v4407_v44  ;;  %4086 = vmatprep.subr.bf16.mxu0 %v4408_v47  ;;  %v1178_v44 = vsub.s32 4, %v4837_v45  ;;  %v1186_v47 = vsub.s32 6, %v4837_v45 }
 0x40d   :  { %4108 = vmatprep.subr.bf16.mxu1 %v4409_v49  ;;  %v1182_v49 = vsub.s32 5, %v4837_v45 }
 0x40f   :  { %4087 = vmatpush3.bf16.msra.mxu0 %v4410_v50  ;;  %v1190_v50 = vsub.s32 7, %v4837_v45 }
 0x410   :  { %4109 = vmatpush3.bf16.msra.mxu1 %v4411_v51  ;;  %4116 = vmatprep.subr.bf16.mxu0 %v4412_v52  ;;  %v1179_v51 = vrot.slane %v4897_v12, %v1178_v44  ;;  %v1187_v52 = vrot.slane %v4897_v12, %v1186_v47 }
 0x411   :  { %4138 = vmatprep.subr.bf16.mxu1 %v4413_v53  ;;  %v1183_v53 = vrot.slane %v4897_v12, %v1182_v49 }
 0x445   :  { %v2555_v59 = vpop.f32.mrb[8].mxu0  ;;  %v2637_v60 = vpop.f32.mrb[8].mxu1 }
 0x446   :  { %v4209_v61 = vadd.f32 %v2555_v59, %v1163_v54  ;;  %v4211_v62 = vadd.f32 %v2637_v60, %v1171_v55  ;;  %v2557_v63 = vpop.f32.mrb[9].mxu0  ;;  %v2639_v1 = vpop.f32.mrb[9].mxu1  ;;  %v1191_v54 = vrot.slane %v4897_v12, %v1190_v50 }
 0x447   :  { %v4210_v2 = vadd.f32 %v2557_v63, %v1167_v57  ;;  %v4212_v3 = vadd.f32 %v2639_v1, %v1175_v58  ;;  %v2559_v46 = vpop.f32.mrb[10].mxu0  ;;  %v2641_v4 = vpop.f32.mrb[10].mxu1 }
 0x448   :  { %v2808_v5 = vmax.f32 %v4209_v61, 0.0  ;;  %v2810_v8 = vmax.f32 %v4211_v62, 0.0  ;;  %v2560_v17 = vpop.f32.mrb[11].mxu0  ;;  %v2642_v9 = vpop.f32.mrb[11].mxu1 }
 0x449   :  { %v2809_v10 = vmax.f32 %v4210_v2, 0.0  ;;  %v2811_v48 = vmax.f32 %v4212_v3, 0.0  ;;  %v4444_v9 = vld [vmem:[#allocation13] sm:$0xff]  }
 0x44a   :  { %v2816_v15 = vpack.c.bf16 %v2808_v5, %v2808_v5  ;;  %v2818_v16 = vpack.c.bf16 %v2810_v8, %v2810_v8 }
 0x44b   :  { %v2817_v11 = vpack.c.bf16 %v2809_v10, %v2809_v10  ;;  %v2819_v13 = vpack.c.bf16 %v2811_v48, %v2811_v48 }
 0x44d   :  { %3375 = vmatprep.mubr.bf16.mxu0 %v2817_v11  ;;  %3415 = vmatprep.mubr.bf16.mxu1 %v2819_v13  ;;  %v4445_v11 = vld [vmem:[#allocation13 + $0x8] sm:$0xff]   ;;  %v4446_v13 = vld [vmem:[#allocation13 + $0x10] sm:$0xff]  }
 0x44e   :  { %3376 = vmatmul.mubr.bf16.vlgmr.msra.gmra.mrb[16].mxu0 %v2816_v15  ;;  %3416 = vmatmul.mubr.bf16.vlgmr.msra.gmra.mrb[16].mxu1 %v2818_v16 }
 0x44f   :  { %4117 = vmatpush3.bf16.msra.mxu0 %v4414_v14  ;;  %4139 = vmatpush3.bf16.msra.mxu1 %v4415_v7  ;;  %v4447_v14 = vld [vmem:[#allocation13 + $0x18] sm:$0xff]   ;;  %v4448_v7 = vld [vmem:[#allocation13 + $0x20] sm:$0xff]  }
 0x450   :  { %4118 = vmatprep.subr.bf16.mxu0 %v4416_v18  ;;  %4140 = vmatprep.subr.bf16.mxu1 %v4417_v29  ;;  %v3989_v18 = vld [vmem:[%s4955_s10] ss:$0 sm:$0xff] }
 0x453   :  { %4119 = vmatpush3.bf16.msra.mxu0 %v4418_v19  ;;  %4141 = vmatpush3.bf16.msra.mxu1 %v4419_v20  ;;  %v4449_v20 = vld [vmem:[#allocation13 + $0x28] sm:$0xff]  }
 0x454   :  { %4120 = vmatprep.subr.bf16.mxu0 %v4420_v21  ;;  %4142 = vmatprep.subr.bf16.mxu1 %v4421_v22 }
 0x457   :  { %4121 = vmatpush3.bf16.msra.mxu0 %v4422_v23  ;;  %4143 = vmatpush3.bf16.msra.mxu1 %v4423_v24 }
 0x458   :  { %4122 = vmatprep.subr.bf16.mxu0 %v4424_v25  ;;  %4144 = vmatprep.subr.bf16.mxu1 %v4425_v26 }
 0x45b   :  { %4123 = vmatpush3.bf16.msra.mxu0 %v4426_v27  ;;  %4145 = vmatpush3.bf16.msra.mxu1 %v4427_v28  ;;  %v4450_v28 = vld [vmem:[#allocation13 + $0x30] sm:$0xff]  }
 0x45c   :  { %4124 = vmatprep.subr.bf16.mxu0 %v4428_v31  ;;  %4146 = vmatprep.subr.bf16.mxu1 %v4429_v32  ;;  %v4451_v32 = vld [vmem:[#allocation13 + $0x38] sm:$0xff]  }
 0x45f   :  { %4125 = vmatpush3.bf16.msra.mxu0 %v4430_v30  ;;  %4147 = vmatpush3.bf16.msra.mxu1 %v4431_v33 }
 0x460   :  { %4126 = vmatprep.subr.bf16.mxu0 %v4432_v56  ;;  %4148 = vmatprep.subr.bf16.mxu1 %v4433_v34 }
 0x463   :  { %4127 = vmatpush3.bf16.msra.mxu0 %v4434_v35  ;;  %4149 = vmatpush3.bf16.msra.mxu1 %v4435_v36 }
 0x464   :  { %4128 = vmatprep.subr.bf16.mxu0 %v4436_v38  ;;  %4150 = vmatprep.subr.bf16.mxu1 %v4437_v39 }
 0x467   :  { %4129 = vmatpush3.bf16.msra.mxu0 %v4438_v37  ;;  %4151 = vmatpush3.bf16.msra.mxu1 %v4439_v40 }
 0x468   :  { %4130 = vmatprep.subr.bf16.mxu0 %v4440_v41  ;;  %4152 = vmatprep.subr.bf16.mxu1 %v4441_v6 }
 0x46b   :  { %4131 = vmatpush3.bf16.msra.mxu0 %v4442_v42  ;;  %4153 = vmatpush3.bf16.msra.mxu1 %v4443_v43 }
 0x46c   :  { %4189 = vmatprep.subr.bf16.mxu0 %v4657_v0 }
 0x4c5   :  { %v2719_v55 = vpop.f32.mrb[12].mxu0 }
 0x4c6   :  { %v4213_v57 = vadd.f32 %v2719_v55, %v1179_v51  ;;  %v2801_v58 = vpop.f32.mrb[12].mxu1  ;;  %v2721_v59 = vpop.f32.mrb[13].mxu0 }
 0x4c7   :  { %v4215_v60 = vadd.f32 %v2801_v58, %v1187_v52  ;;  %v4214_v61 = vadd.f32 %v2721_v59, %v1183_v53  ;;  %v2803_v62 = vpop.f32.mrb[13].mxu1  ;;  %v2723_v63 = vpop.f32.mrb[14].mxu0 }
 0x4c8   :  { %v2812_v1 = vmax.f32 %v4213_v57, 0.0  ;;  %v4216_v2 = vadd.f32 %v2803_v62, %v1191_v54  ;;  %v2805_v3 = vpop.f32.mrb[14].mxu1  ;;  %v2724_v45 = vpop.f32.mrb[15].mxu0 }
 0x4c9   :  { %v2814_v46 = vmax.f32 %v4215_v60, 0.0  ;;  %v2813_v4 = vmax.f32 %v4214_v61, 0.0  ;;  %v2806_v5 = vpop.f32.mrb[15].mxu1 }
 0x4ca   :  { %v2815_v8 = vmax.f32 %v4216_v2, 0.0  ;;  %v2820_v10 = vpack.c.bf16 %v2812_v1, %v2812_v1 }
 0x4cb   :  { %v2821_v17 = vpack.c.bf16 %v2813_v4, %v2813_v4  ;;  %v2822_v48 = vpack.c.bf16 %v2814_v46, %v2814_v46 }
 0x4cc   :  { %v2823_v12 = vpack.c.bf16 %v2815_v8, %v2815_v8 }
 0x4cd   :  { %3455 = vmatprep.mubr.bf16.mxu0 %v2821_v17 }
 0x4ce   :  { %3495 = vmatprep.mubr.bf16.mxu1 %v2823_v12  ;;  %3456 = vmatmul.mubr.bf16.vlgmr.msra.gmra.mrb[20].mxu0 %v2820_v10 }
 0x4cf   :  { %3496 = vmatmul.mubr.bf16.vlgmr.msra.gmra.mrb[20].mxu1 %v2822_v48  ;;  %4190 = vmatpush3.bf16.msra.mxu0 %v4444_v9 }
 0x4d0   :  { %4191 = vmatprep.subr.bf16.mxu0 %v4657_v0  ;;  %4205 = vmatprep.mubr.msk.bf16.mxu0 %vm4658_vm0, %v4657_v0 }
 0x4d3   :  { %4192 = vmatpush3.bf16.msra.mxu0 %v4445_v11 }
 0x4d4   :  { %4193 = vmatprep.subr.bf16.mxu0 %v4657_v0 }
 0x4d7   :  { %4194 = vmatpush3.bf16.msra.mxu0 %v4446_v13 }
 0x4d8   :  { %4195 = vmatprep.subr.bf16.mxu0 %v4657_v0 }
 0x4db   :  { %4196 = vmatpush3.bf16.msra.mxu0 %v4447_v14 }
 0x4dc   :  { %4197 = vmatprep.subr.bf16.mxu0 %v4657_v0 }
 0x4df   :  { %4198 = vmatpush3.bf16.msra.mxu0 %v4448_v7 }
 0x4e0   :  { %4199 = vmatprep.subr.bf16.mxu0 %v4657_v0 }
 0x4e3   :  { %4200 = vmatpush3.bf16.msra.mxu0 %v4449_v20 }
 0x4e4   :  { %4201 = vmatprep.subr.bf16.mxu0 %v4657_v0 }
 0x4e7   :  { %4202 = vmatpush3.bf16.msra.mxu0 %v4450_v28 }
 0x4e8   :  { %4203 = vmatprep.subr.bf16.mxu0 %v4657_v0  ;;  %v4054_v0 = vld [vmem:[%s4957_s12] ss:$0 sm:$0xff]  ;;  %s4610_s12 = scalar_lea.vmem %s3633_s3, 128 }
 0x4e9   :  { %p4611_p0 = scmp.ne.s32.totalorder %s3633_s3, %s4610_s12  ;;  %p4616_p2 = scmp.lt.s32.totalorder %s4610_s12, %s4610_s12 }
 0x4eb   :  { %4204 = vmatpush3.bf16.msra.mxu0 %v4451_v32  ;;  %p4617_p3 = por %p4616_p2, %p4615_p1 }
 0x4ed   :  { %p4618_p4 = pnand %p4617_p3, %p4611_p0 }
 0x521   :  { %v4088_v15 = vpop.f32.mrb[16].mxu0  ;;  %v4110_v16 = vpop.f32.mrb[16].mxu1 }
 0x522   :  { %v4089_v29 = vpop.f32.mrb[17].mxu0  ;;  %v4111_v19 = vpop.f32.mrb[17].mxu1 }
 0x523   :  { %v4090_v21 = vadd.f32 %v4089_v29, %v4088_v15  ;;  %v4112_v22 = vadd.f32 %v4111_v19, %v4110_v16  ;;  %v4091_v23 = vpop.f32.mrb[18].mxu0  ;;  %v4113_v24 = vpop.f32.mrb[18].mxu1 }
 0x524   :  { %v4092_v25 = vpop.f32.mrb[19].mxu0  ;;  %v4114_v26 = vpop.f32.mrb[19].mxu1 }
 0x525   :  { %v3378_v27 = vadd.f32 %v4090_v21, %v3989_v18 }
 0x527   :  { %v3418_v31 = vadd.f32 %v4112_v22, %v3378_v27 }
 0x5a1   :  { %v4132_v30 = vpop.f32.mrb[20].mxu0 }
 0x5a2   :  { %v4154_v33 = vpop.f32.mrb[20].mxu1  ;;  %v4133_v56 = vpop.f32.mrb[21].mxu0 }
 0x5a3   :  { %v4134_v34 = vadd.f32 %v4133_v56, %v4132_v30  ;;  %v4155_v35 = vpop.f32.mrb[21].mxu1  ;;  %v4135_v36 = vpop.f32.mrb[22].mxu0 }
 0x5a4   :  { %v4156_v38 = vadd.f32 %v4155_v35, %v4154_v33  ;;  %v4157_v39 = vpop.f32.mrb[22].mxu1  ;;  %v4136_v37 = vpop.f32.mrb[23].mxu0 }
 0x5a5   :  { %v3458_v40 = vadd.f32 %v4134_v34, %v3418_v31  ;;  %v4158_v41 = vpop.f32.mrb[23].mxu1 }
 0x5a7   :  { %v3498_v6 = vadd.f32 %v4156_v38, %v3458_v40 }
 0x5a9   :  { %v3503_v42 = vmax.f32 %v3498_v6, 0.0 }
 0x5ab   :  { %v3504_v43 = vpack.c.bf16 %v3503_v42, %v3503_v42 }
 0x5ad   :  { %4206 = vmatmul.mubr.bf16.vlgmr.msra.gmra.mrb[24].mxu0 %v3504_v43 }
 0x680   :  { %v3610_v44 = vpop.f32.mrb[24].mxu0 }
 0x681   :  { %v3611_v47 = vadd.f32 %v4054_v0, %v3610_v44  ;;  %v4207_v49 = vpop.f32.mrb[25].mxu0 }
 0x682   :  { %v3613_v50 = vpop.f32.mrb[26].mxu0 }
 0x683   :  { %3616 = vmax.xlane.f32.xlu0 %v3611_v47  ;;  %v4208_v51 = vpop.f32.mrb[27].mxu0 }
 0x710   :  { %v3617_v52 = vpop.xlane.xlu0 %3616 }
 0x711   :  { %v3618_v53 = vsub.f32 %v3611_v47, %v3617_v52 }
 0x713   :  { %v3619_v54 = vmul.f32 1.442695, %v3618_v53 }
 0x715   :  { %4452 = vpow2.f32 %v3619_v54 }
 0x71f   :  { %v4453_v55 = vpop.eup %4452 }
 0x720   :  { %3621 = vadd.xlane.f32.xlu0 %v4453_v55 }
 0x7ad   :  { %v3622_v57 = vpop.xlane.xlu0 %3621 }
 0x7ae   :  { %4454 = vrcp.f32 %v3622_v57 }
 0x7b8   :  { %v4455_v58 = vpop.eup %4454 }
 0x7b9   :  { %v3624_v59 = vmul.f32 %v4455_v58, %v4453_v55 }
 0x7bb   :  { %3625 = vst [vmem:[#allocation14] sm:$0xff] %v3624_v59 }
 0x7bc   :  { %4621 = shalt.err (!%p4618_p4)
}
 0x7bd   :  { %s4622_s26 = scalar_lea.hbm %s4958_s13, 128 }
 0x7be   :  { %p4623_p5 = scmp.ne.s32.totalorder %s4958_s13, %s4622_s26  ;;  %p4626_p6 = scmp.lt.u32.totalorder %s4622_s26, %s4958_s13 }
 0x7c0   :  { %p4628_p7 = pnand %p4626_p6, %p4623_p5 }
 0x7c2   :  { %4631 = shalt.err (!%p4628_p7)
}
 0x7c3   :  { %3635 = dma.vmem_to_hbm [thread:$0]  %s3633_s3, 128, %s4958_s13, [#allocation4]  }
 0x7c4   :  { %4640 = dma.done.wait [#allocation4], 128  }
 0x7c5   :  { %4641 = vsyncadd [#allocation4], 4294967168 }
 0x7c6   :  { %3639 = vsyncpa [#allocation3], 1 }
 0x7c7   :  { %3640 = vsyncpa [#allocation6], 1 }
 0x7c8   :  { %3641 = vsyncpa [#allocation9], 1 }
 0x7c9   :  { %3642 = vsyncpa [#allocation12], 1 }
 0x7ca   :  { %3643 = vsyncpa [#allocation4], 1 }

</bundles_post_ra>
